<compile_context>
chip_gen: v6e
topology: v6e:2x2x1
jax: 0.10.0
libtpu: 0.0.40
codegen_flags: <defaults>
</compile_context>

<pallas_src>
import functools

import jax
import jax.numpy as jnp
import numpy as np
from jax.experimental import pallas as pl
from jax.experimental.pallas import tpu as pltpu

K = 7      # conv kernel size
PAD = 3    # conv padding ("same")


def _sam_kernel(w_ref, col_ref, x_ref, out_ref, pbuf, *, Bblk, C, H, W):
    # w_ref   : SMEM (2*K*K,) f32 conv weights [49 max-plane taps, 49 avg-plane taps]
    # col_ref : VMEM (1, HW) int32 -- x coordinate of every flat spatial lane
    # x_ref   : VMEM (Bblk, C, HW) input block, lane-dense flat spatial view
    # out_ref : VMEM (Bblk, C, HW)
    # pbuf    : VMEM scratch (2*Bblk, LP): y-padded flat [max planes | avg planes]
    HW = H * W
    LP = (H + 2 * PAD) * W + 2 * PAD      # padded flat plane length (+ x slack)
    LO = PAD * W + PAD                    # flat offset of pixel (y=0, x=0)

    xv = x_ref[...]                                    # (Bblk, C, HW)
    xf = xv.astype(jnp.float32)

    # ---- channel max / mean, vectorized over the channel (sublane) axis ----
    mx = jnp.max(xf, axis=1)                           # (Bblk, HW)
    av = jnp.sum(xf, axis=1) * (1.0 / C)               # (Bblk, HW)

    # ---- zero only the y-padding borders (interior fully overwritten each
    #      step).  Re-done every step so it stays correct when the parallel
    #      batch axis is sharded across TensorCores (per-core scratch). ----
    zb = jnp.zeros((2 * Bblk, LO), jnp.float32)
    pbuf[:, 0:LO] = zb
    pbuf[:, LO + HW:LP] = zb                           # LP - LO - HW == LO
    pbuf[0:Bblk, LO:LO + HW] = mx
    pbuf[Bblk:2 * Bblk, LO:LO + HW] = av

    # Load the padded planes back ONCE; the 49 tap windows below are value
    # slices (register lane realign on the otherwise-idle XLU), not VMEM
    # reloads.
    P = pbuf[...]                                      # (2*Bblk, LP)
    Pm = P[0:Bblk]                                     # max planes
    Pa = P[Bblk:2 * Bblk]                              # avg planes

    col = col_ref[...]                                 # (1, HW) int32

    # ---- 2-in / 1-out 7x7 "same" conv.  Tap (dy, dx) of output pixel
    # i = y*W + x reads P[:, i + dy*W + dx]; rows outside [0, H) hit the zero
    # border; columns outside [0, W) are zeroed by one select per dx. ----
    acc = None
    for dx in range(K):
        acc_dx = None
        for dy in range(K):
            off = dy * W + dx
            t = (w_ref[dy * K + dx] * Pm[:, off:off + HW]
                 + w_ref[K * K + dy * K + dx] * Pa[:, off:off + HW])
            acc_dx = t if acc_dx is None else acc_dx + t
        if dx == PAD:
            masked = acc_dx                            # centre column: always valid
        else:
            shifted = col + (dx - PAD)
            valid = (shifted < W) if dx > PAD else (shifted >= 0)
            masked = jnp.where(valid, acc_dx, 0.0)     # (1,HW) mask broadcasts
        acc = masked if acc is None else acc + masked

    # ---- attention map * input, broadcast over channels (lane-dense stores).
    # Multiply in the input dtype (bf16 stays bf16 on v6e/v7x); conv and
    # reductions above stay in f32. ----
    attn = acc.astype(xv.dtype)                        # (Bblk, HW)
    out_ref[...] = (attn[:, None, :] * xv).astype(out_ref.dtype)


def _vmem_capacity_bytes():
    """Physical VMEM per core (generation-aware), conservative fallback."""
    try:
        info = pltpu.get_tpu_info()
        cap = getattr(info, "vmem_capacity_bytes", None)
        if cap:
            return int(cap)
    except Exception:
        pass
    return 64 << 20   # v7x-sized conservative default


def _choose_bblk(B, per_image_block_bytes, plane_bytes_per_image, budget):
    """Largest divisor of B (<=8) whose double-buffered blocks fit the VMEM
    budget, preferring choices that leave >=2 grid steps (megacore)."""
    divisors = [d for d in range(1, min(B, 8) + 1) if B % d == 0]

    def need(d):
        # in + out blocks (double-buffered) + scratch + slack
        return 4 * d * per_image_block_bytes + d * plane_bytes_per_image + (4 << 20)

    fitting = [d for d in divisors if need(d) <= budget]
    if not fitting:
        return 1
    multi_step = [d for d in fitting if B // d >= 2]
    return max(multi_step) if multi_step else max(fitting)


def sam_forward(x, w):
    """x: (B, C, H, W), w: (1, 2, 7, 7) float32 (OIHW, torch layout)."""
    B, C, H, W = x.shape
    HW = H * W
    LP = (H + 2 * PAD) * W + 2 * PAD
    itemsize = jnp.dtype(x.dtype).itemsize

    # Free bitcast view / tiny host-side constants.
    x_flat = x.reshape(B, C, HW)
    w_flat = w.reshape(-1).astype(jnp.float32)                     # (2*K*K,)
    col_ids = jnp.asarray((np.arange(HW, dtype=np.int32) % W).reshape(1, HW))

    # Generation-aware VMEM budget and batch-block choice.
    budget = int(0.75 * _vmem_capacity_bytes())
    per_image = C * HW * itemsize
    plane_bytes = 2 * LP * 4
    Bblk = _choose_bblk(B, per_image, plane_bytes, budget)
    need = 4 * Bblk * per_image + Bblk * plane_bytes + 2 * HW * 4 + (4 << 20)
    vmem_bytes = int(min(max(need, 8 << 20), budget))
    # NOTE: for very large C*H*W (single image block not fitting the budget),
    # tile C as an additional "arbitrary" grid axis.  Not needed at SAM shapes.

    kernel = functools.partial(_sam_kernel, Bblk=Bblk, C=C, H=H, W=W)

    cost = pl.CostEstimate(
        flops=int(B * HW * (2 * 2 * K * K) + 3 * B * C * HW),
        transcendentals=0,
        bytes_accessed=int(2 * B * C * HW * itemsize),
    )

    out_flat = pl.pallas_call(
        kernel,
        out_shape=jax.ShapeDtypeStruct((B, C, HW), x.dtype),
        grid=(B // Bblk,),
        in_specs=[
            pl.BlockSpec(memory_space=pltpu.MemorySpace.SMEM),      # conv weights
            pl.BlockSpec((1, HW), lambda b: (0, 0)),                # column indices
            pl.BlockSpec((Bblk, C, HW), lambda b: (b, 0, 0)),       # x block
        ],
        out_specs=pl.BlockSpec((Bblk, C, HW), lambda b: (b, 0, 0)),
        scratch_shapes=[pltpu.VMEM((2 * Bblk, LP), jnp.float32)],
        compiler_params=pltpu.CompilerParams(
            dimension_semantics=("parallel",),     # batch blocks are independent
            vmem_limit_bytes=vmem_bytes,
        ),
        cost_estimate=cost,
    )(w_flat, col_ids, x_flat)

    return out_flat.reshape(B, C, H, W)


def sam_reference(x, w):
    """Pure-JAX reference matching the PyTorch forward exactly."""
    mx = jnp.max(x, axis=1, keepdims=True)
    av = jnp.mean(x, axis=1, keepdims=True)
    concat = jnp.concatenate([mx, av], axis=1)               # (B, 2, H, W)
    attn = jax.lax.conv_general_dilated(
        concat, w,
        window_strides=(1, 1),
        padding=((PAD, PAD), (PAD, PAD)),
        dimension_numbers=("NCHW", "OIHW", "NCHW"),
    )                                                         # (B, 1, H, W)
    return attn * x


if __name__ == "__main__":
    B, C, H, W = 2, 4, 16, 16

    key = jax.random.PRNGKey(0)
    kx, kw = jax.random.split(key)
    x = jax.random.normal(kx, (B, C, H, W), dtype=jnp.float32)
    # nn.Conv2d(2, 1, 7, bias=False) -> weight shape (1, 2, 7, 7)
    w = 0.1 * jax.random.normal(kw, (1, 2, K, K), dtype=jnp.float32)

    out = sam_forward(x, w)
    out = jax.block_until_ready(out)

    ref = sam_reference(x, w)
    np.testing.assert_allclose(np.asarray(out), np.asarray(ref), rtol=1e-5, atol=1e-5)

    print("KERNEL_OK")
</pallas_src>

<mosaic_0001>
module attributes {stable_mosaic.version = 11 : i64} {
  func.func @_sam_kernel(%arg0: i32, %arg1: memref<98xf32, #tpu.memory_space<smem>>, %arg2: memref<1x256xi32, #tpu.memory_space<vmem>>, %arg3: memref<1x4x256xf32, #tpu.memory_space<vmem>>, %arg4: memref<1x4x256xf32, #tpu.memory_space<vmem>>, %arg5: memref<2x358xf32, #tpu.memory_space<vmem>>) attributes {dimension_semantics = [#tpu.dimension_semantics<parallel>], iteration_bounds = array<i64: 2>, scalar_prefetch = 0 : i64, scratch_operands = 1 : i64, tpu.core_type = #tpu.core_type<tc>, window_params = [{transform_indices = @transform_0, window_bounds = array<i64: 98>}, {pipeline_mode = #tpu.pipeline_mode<synchronous>, transform_indices = @transform_1, window_bounds = array<i64: 1, 256>}, {transform_indices = @transform_2, window_bounds = array<i64: 1, 4, 256>}, {transform_indices = @transform_3, window_bounds = array<i64: 1, 4, 256>}]} {
    %c0 = arith.constant 0 : index
    %c0_0 = arith.constant 0 : index
    %c0_1 = arith.constant 0 : index
    %0 = vector.load %arg3[%c0, %c0_0, %c0_1] : memref<1x4x256xf32, #tpu.memory_space<vmem>>, vector<1x4x256xf32>
    %cst = arith.constant dense<0xFF800000> : vector<1x256xf32>
    %1 = vector.multi_reduction <maximumf>, %0, %cst [1] : vector<1x4x256xf32> to vector<1x256xf32>
    %cst_2 = arith.constant dense<0.000000e+00> : vector<1x256xf32>
    %2 = vector.multi_reduction <add>, %0, %cst_2 [1] : vector<1x4x256xf32> to vector<1x256xf32>
    %cst_3 = arith.constant 2.500000e-01 : f32
    %3 = vector.broadcast %cst_3 : f32 to vector<1x256xf32>
    %4 = arith.mulf %2, %3 : vector<1x256xf32>
    %cst_4 = arith.constant 0.000000e+00 : f32
    %5 = vector.broadcast %cst_4 : f32 to vector<2x51xf32>
    %c0_5 = arith.constant 0 : index
    %c0_6 = arith.constant 0 : index
    %6 = vector.load %arg5[%c0_5, %c0_6] : memref<2x358xf32, #tpu.memory_space<vmem>>, vector<2x51xf32>
    tpu.vector_store %arg5[%c0_5, %c0_6], %5 {strides = array<i32>} : memref<2x358xf32, #tpu.memory_space<vmem>>, vector<2x51xf32>,
    %c0_7 = arith.constant 0 : index
    %c307 = arith.constant 307 : index
    %7 = vector.load %arg5[%c0_7, %c307] : memref<2x358xf32, #tpu.memory_space<vmem>>, vector<2x51xf32>
    tpu.vector_store %arg5[%c0_7, %c307], %5 {strides = array<i32>} : memref<2x358xf32, #tpu.memory_space<vmem>>, vector<2x51xf32>,
    %c0_8 = arith.constant 0 : index
    %c51 = arith.constant 51 : index
    %8 = vector.load %arg5[%c0_8, %c51] : memref<2x358xf32, #tpu.memory_space<vmem>>, vector<1x256xf32>
    tpu.vector_store %arg5[%c0_8, %c51], %1 {strides = array<i32>} : memref<2x358xf32, #tpu.memory_space<vmem>>, vector<1x256xf32>,
    %c1 = arith.constant 1 : index
    %c51_9 = arith.constant 51 : index
    %9 = vector.load %arg5[%c1, %c51_9] : memref<2x358xf32, #tpu.memory_space<vmem>>, vector<1x256xf32>
    tpu.vector_store %arg5[%c1, %c51_9], %4 {strides = array<i32>} : memref<2x358xf32, #tpu.memory_space<vmem>>, vector<1x256xf32>,
    %c0_10 = arith.constant 0 : index
    %c0_11 = arith.constant 0 : index
    %10 = vector.load %arg5[%c0_10, %c0_11] : memref<2x358xf32, #tpu.memory_space<vmem>>, vector<2x358xf32>
    %11 = vector.extract_strided_slice %10 {offsets = [0, 0], sizes = [1, 358], strides = [1, 1]} : vector<2x358xf32> to vector<1x358xf32>
    %12 = vector.extract_strided_slice %10 {offsets = [1, 0], sizes = [1, 358], strides = [1, 1]} : vector<2x358xf32> to vector<1x358xf32>
    %c0_12 = arith.constant 0 : index
    %c0_13 = arith.constant 0 : index
    %13 = vector.load %arg2[%c0_12, %c0_13] : memref<1x256xi32, #tpu.memory_space<vmem>>, vector<1x256xi32>
    %c0_14 = arith.constant 0 : index
    %14 = memref.load %arg1[%c0_14] : memref<98xf32, #tpu.memory_space<smem>>
    %15 = vector.extract_strided_slice %11 {offsets = [0, 0], sizes = [1, 256], strides = [1, 1]} : vector<1x358xf32> to vector<1x256xf32>
    %16 = vector.broadcast %14 : f32 to vector<1x256xf32>
    %17 = arith.mulf %16, %15 : vector<1x256xf32>
    %c49 = arith.constant 49 : index
    %18 = memref.load %arg1[%c49] : memref<98xf32, #tpu.memory_space<smem>>
    %19 = vector.extract_strided_slice %12 {offsets = [0, 0], sizes = [1, 256], strides = [1, 1]} : vector<1x358xf32> to vector<1x256xf32>
    %20 = vector.broadcast %18 : f32 to vector<1x256xf32>
    %21 = arith.mulf %20, %19 : vector<1x256xf32>
    %22 = arith.addf %17, %21 : vector<1x256xf32>
    %c7 = arith.constant 7 : index
    %23 = memref.load %arg1[%c7] : memref<98xf32, #tpu.memory_space<smem>>
    %24 = vector.extract_strided_slice %11 {offsets = [0, 16], sizes = [1, 256], strides = [1, 1]} : vector<1x358xf32> to vector<1x256xf32>
    %25 = vector.broadcast %23 : f32 to vector<1x256xf32>
    %26 = arith.mulf %25, %24 : vector<1x256xf32>
    %c56 = arith.constant 56 : index
    %27 = memref.load %arg1[%c56] : memref<98xf32, #tpu.memory_space<smem>>
    %28 = vector.extract_strided_slice %12 {offsets = [0, 16], sizes = [1, 256], strides = [1, 1]} : vector<1x358xf32> to vector<1x256xf32>
    %29 = vector.broadcast %27 : f32 to vector<1x256xf32>
    %30 = arith.mulf %29, %28 : vector<1x256xf32>
    %31 = arith.addf %26, %30 : vector<1x256xf32>
    %32 = arith.addf %22, %31 : vector<1x256xf32>
    %c14 = arith.constant 14 : index
    %33 = memref.load %arg1[%c14] : memref<98xf32, #tpu.memory_space<smem>>
    %34 = vector.extract_strided_slice %11 {offsets = [0, 32], sizes = [1, 256], strides = [1, 1]} : vector<1x358xf32> to vector<1x256xf32>
    %35 = vector.broadcast %33 : f32 to vector<1x256xf32>
    %36 = arith.mulf %35, %34 : vector<1x256xf32>
    %c63 = arith.constant 63 : index
    %37 = memref.load %arg1[%c63] : memref<98xf32, #tpu.memory_space<smem>>
    %38 = vector.extract_strided_slice %12 {offsets = [0, 32], sizes = [1, 256], strides = [1, 1]} : vector<1x358xf32> to vector<1x256xf32>
    %39 = vector.broadcast %37 : f32 to vector<1x256xf32>
    %40 = arith.mulf %39, %38 : vector<1x256xf32>
    %41 = arith.addf %36, %40 : vector<1x256xf32>
    %42 = arith.addf %32, %41 : vector<1x256xf32>
    %c21 = arith.constant 21 : index
    %43 = memref.load %arg1[%c21] : memref<98xf32, #tpu.memory_space<smem>>
    %44 = vector.extract_strided_slice %11 {offsets = [0, 48], sizes = [1, 256], strides = [1, 1]} : vector<1x358xf32> to vector<1x256xf32>
    %45 = vector.broadcast %43 : f32 to vector<1x256xf32>
    %46 = arith.mulf %45, %44 : vector<1x256xf32>
    %c70 = arith.constant 70 : index
    %47 = memref.load %arg1[%c70] : memref<98xf32, #tpu.memory_space<smem>>
    %48 = vector.extract_strided_slice %12 {offsets = [0, 48], sizes = [1, 256], strides = [1, 1]} : vector<1x358xf32> to vector<1x256xf32>
    %49 = vector.broadcast %47 : f32 to vector<1x256xf32>
    %50 = arith.mulf %49, %48 : vector<1x256xf32>
    %51 = arith.addf %46, %50 : vector<1x256xf32>
    %52 = arith.addf %42, %51 : vector<1x256xf32>
    %c28 = arith.constant 28 : index
    %53 = memref.load %arg1[%c28] : memref<98xf32, #tpu.memory_space<smem>>
    %54 = vector.extract_strided_slice %11 {offsets = [0, 64], sizes = [1, 256], strides = [1, 1]} : vector<1x358xf32> to vector<1x256xf32>
    %55 = vector.broadcast %53 : f32 to vector<1x256xf32>
    %56 = arith.mulf %55, %54 : vector<1x256xf32>
    %c77 = arith.constant 77 : index
    %57 = memref.load %arg1[%c77] : memref<98xf32, #tpu.memory_space<smem>>
    %58 = vector.extract_strided_slice %12 {offsets = [0, 64], sizes = [1, 256], strides = [1, 1]} : vector<1x358xf32> to vector<1x256xf32>
    %59 = vector.broadcast %57 : f32 to vector<1x256xf32>
    %60 = arith.mulf %59, %58 : vector<1x256xf32>
    %61 = arith.addf %56, %60 : vector<1x256xf32>
    %62 = arith.addf %52, %61 : vector<1x256xf32>
    %c35 = arith.constant 35 : index
    %63 = memref.load %arg1[%c35] : memref<98xf32, #tpu.memory_space<smem>>
    %64 = vector.extract_strided_slice %11 {offsets = [0, 80], sizes = [1, 256], strides = [1, 1]} : vector<1x358xf32> to vector<1x256xf32>
    %65 = vector.broadcast %63 : f32 to vector<1x256xf32>
    %66 = arith.mulf %65, %64 : vector<1x256xf32>
    %c84 = arith.constant 84 : index
    %67 = memref.load %arg1[%c84] : memref<98xf32, #tpu.memory_space<smem>>
    %68 = vector.extract_strided_slice %12 {offsets = [0, 80], sizes = [1, 256], strides = [1, 1]} : vector<1x358xf32> to vector<1x256xf32>
    %69 = vector.broadcast %67 : f32 to vector<1x256xf32>
    %70 = arith.mulf %69, %68 : vector<1x256xf32>
    %71 = arith.addf %66, %70 : vector<1x256xf32>
    %72 = arith.addf %62, %71 : vector<1x256xf32>
    %c42 = arith.constant 42 : index
    %73 = memref.load %arg1[%c42] : memref<98xf32, #tpu.memory_space<smem>>
    %74 = vector.extract_strided_slice %11 {offsets = [0, 96], sizes = [1, 256], strides = [1, 1]} : vector<1x358xf32> to vector<1x256xf32>
    %75 = vector.broadcast %73 : f32 to vector<1x256xf32>
    %76 = arith.mulf %75, %74 : vector<1x256xf32>
    %c91 = arith.constant 91 : index
    %77 = memref.load %arg1[%c91] : memref<98xf32, #tpu.memory_space<smem>>
    %78 = vector.extract_strided_slice %12 {offsets = [0, 96], sizes = [1, 256], strides = [1, 1]} : vector<1x358xf32> to vector<1x256xf32>
    %79 = vector.broadcast %77 : f32 to vector<1x256xf32>
    %80 = arith.mulf %79, %78 : vector<1x256xf32>
    %81 = arith.addf %76, %80 : vector<1x256xf32>
    %82 = arith.addf %72, %81 : vector<1x256xf32>
    %c-3_i32 = arith.constant -3 : i32
    %83 = vector.broadcast %c-3_i32 : i32 to vector<1x256xi32>
    %84 = arith.addi %13, %83 : vector<1x256xi32>
    %c0_i32 = arith.constant 0 : i32
    %85 = vector.broadcast %c0_i32 : i32 to vector<1x256xi32>
    %86 = arith.cmpi sge, %84, %85 : vector<1x256xi32>
    %cst_15 = arith.constant 0.000000e+00 : f32
    %87 = vector.broadcast %cst_15 : f32 to vector<1x256xf32>
    %88 = arith.select %86, %82, %87 : vector<1x256xi1>, vector<1x256xf32>
    %c1_16 = arith.constant 1 : index
    %89 = memref.load %arg1[%c1_16] : memref<98xf32, #tpu.memory_space<smem>>
    %90 = vector.extract_strided_slice %11 {offsets = [0, 1], sizes = [1, 256], strides = [1, 1]} : vector<1x358xf32> to vector<1x256xf32>
    %91 = vector.broadcast %89 : f32 to vector<1x256xf32>
    %92 = arith.mulf %91, %90 : vector<1x256xf32>
    %c50 = arith.constant 50 : index
    %93 = memref.load %arg1[%c50] : memref<98xf32, #tpu.memory_space<smem>>
    %94 = vector.extract_strided_slice %12 {offsets = [0, 1], sizes = [1, 256], strides = [1, 1]} : vector<1x358xf32> to vector<1x256xf32>
    %95 = vector.broadcast %93 : f32 to vector<1x256xf32>
    %96 = arith.mulf %95, %94 : vector<1x256xf32>
    %97 = arith.addf %92, %96 : vector<1x256xf32>
    %c8 = arith.constant 8 : index
    %98 = memref.load %arg1[%c8] : memref<98xf32, #tpu.memory_space<smem>>
    %99 = vector.extract_strided_slice %11 {offsets = [0, 17], sizes = [1, 256], strides = [1, 1]} : vector<1x358xf32> to vector<1x256xf32>
    %100 = vector.broadcast %98 : f32 to vector<1x256xf32>
    %101 = arith.mulf %100, %99 : vector<1x256xf32>
    %c57 = arith.constant 57 : index
    %102 = memref.load %arg1[%c57] : memref<98xf32, #tpu.memory_space<smem>>
    %103 = vector.extract_strided_slice %12 {offsets = [0, 17], sizes = [1, 256], strides = [1, 1]} : vector<1x358xf32> to vector<1x256xf32>
    %104 = vector.broadcast %102 : f32 to vector<1x256xf32>
    %105 = arith.mulf %104, %103 : vector<1x256xf32>
    %106 = arith.addf %101, %105 : vector<1x256xf32>
    %107 = arith.addf %97, %106 : vector<1x256xf32>
    %c15 = arith.constant 15 : index
    %108 = memref.load %arg1[%c15] : memref<98xf32, #tpu.memory_space<smem>>
    %109 = vector.extract_strided_slice %11 {offsets = [0, 33], sizes = [1, 256], strides = [1, 1]} : vector<1x358xf32> to vector<1x256xf32>
    %110 = vector.broadcast %108 : f32 to vector<1x256xf32>
    %111 = arith.mulf %110, %109 : vector<1x256xf32>
    %c64 = arith.constant 64 : index
    %112 = memref.load %arg1[%c64] : memref<98xf32, #tpu.memory_space<smem>>
    %113 = vector.extract_strided_slice %12 {offsets = [0, 33], sizes = [1, 256], strides = [1, 1]} : vector<1x358xf32> to vector<1x256xf32>
    %114 = vector.broadcast %112 : f32 to vector<1x256xf32>
    %115 = arith.mulf %114, %113 : vector<1x256xf32>
    %116 = arith.addf %111, %115 : vector<1x256xf32>
    %117 = arith.addf %107, %116 : vector<1x256xf32>
    %c22 = arith.constant 22 : index
    %118 = memref.load %arg1[%c22] : memref<98xf32, #tpu.memory_space<smem>>
    %119 = vector.extract_strided_slice %11 {offsets = [0, 49], sizes = [1, 256], strides = [1, 1]} : vector<1x358xf32> to vector<1x256xf32>
    %120 = vector.broadcast %118 : f32 to vector<1x256xf32>
    %121 = arith.mulf %120, %119 : vector<1x256xf32>
    %c71 = arith.constant 71 : index
    %122 = memref.load %arg1[%c71] : memref<98xf32, #tpu.memory_space<smem>>
    %123 = vector.extract_strided_slice %12 {offsets = [0, 49], sizes = [1, 256], strides = [1, 1]} : vector<1x358xf32> to vector<1x256xf32>
    %124 = vector.broadcast %122 : f32 to vector<1x256xf32>
    %125 = arith.mulf %124, %123 : vector<1x256xf32>
    %126 = arith.addf %121, %125 : vector<1x256xf32>
    %127 = arith.addf %117, %126 : vector<1x256xf32>
    %c29 = arith.constant 29 : index
    %128 = memref.load %arg1[%c29] : memref<98xf32, #tpu.memory_space<smem>>
    %129 = vector.extract_strided_slice %11 {offsets = [0, 65], sizes = [1, 256], strides = [1, 1]} : vector<1x358xf32> to vector<1x256xf32>
    %130 = vector.broadcast %128 : f32 to vector<1x256xf32>
    %131 = arith.mulf %130, %129 : vector<1x256xf32>
    %c78 = arith.constant 78 : index
    %132 = memref.load %arg1[%c78] : memref<98xf32, #tpu.memory_space<smem>>
    %133 = vector.extract_strided_slice %12 {offsets = [0, 65], sizes = [1, 256], strides = [1, 1]} : vector<1x358xf32> to vector<1x256xf32>
    %134 = vector.broadcast %132 : f32 to vector<1x256xf32>
    %135 = arith.mulf %134, %133 : vector<1x256xf32>
    %136 = arith.addf %131, %135 : vector<1x256xf32>
    %137 = arith.addf %127, %136 : vector<1x256xf32>
    %c36 = arith.constant 36 : index
    %138 = memref.load %arg1[%c36] : memref<98xf32, #tpu.memory_space<smem>>
    %139 = vector.extract_strided_slice %11 {offsets = [0, 81], sizes = [1, 256], strides = [1, 1]} : vector<1x358xf32> to vector<1x256xf32>
    %140 = vector.broadcast %138 : f32 to vector<1x256xf32>
    %141 = arith.mulf %140, %139 : vector<1x256xf32>
    %c85 = arith.constant 85 : index
    %142 = memref.load %arg1[%c85] : memref<98xf32, #tpu.memory_space<smem>>
    %143 = vector.extract_strided_slice %12 {offsets = [0, 81], sizes = [1, 256], strides = [1, 1]} : vector<1x358xf32> to vector<1x256xf32>
    %144 = vector.broadcast %142 : f32 to vector<1x256xf32>
    %145 = arith.mulf %144, %143 : vector<1x256xf32>
    %146 = arith.addf %141, %145 : vector<1x256xf32>
    %147 = arith.addf %137, %146 : vector<1x256xf32>
    %c43 = arith.constant 43 : index
    %148 = memref.load %arg1[%c43] : memref<98xf32, #tpu.memory_space<smem>>
    %149 = vector.extract_strided_slice %11 {offsets = [0, 97], sizes = [1, 256], strides = [1, 1]} : vector<1x358xf32> to vector<1x256xf32>
    %150 = vector.broadcast %148 : f32 to vector<1x256xf32>
    %151 = arith.mulf %150, %149 : vector<1x256xf32>
    %c92 = arith.constant 92 : index
    %152 = memref.load %arg1[%c92] : memref<98xf32, #tpu.memory_space<smem>>
    %153 = vector.extract_strided_slice %12 {offsets = [0, 97], sizes = [1, 256], strides = [1, 1]} : vector<1x358xf32> to vector<1x256xf32>
    %154 = vector.broadcast %152 : f32 to vector<1x256xf32>
    %155 = arith.mulf %154, %153 : vector<1x256xf32>
    %156 = arith.addf %151, %155 : vector<1x256xf32>
    %157 = arith.addf %147, %156 : vector<1x256xf32>
    %c-2_i32 = arith.constant -2 : i32
    %158 = vector.broadcast %c-2_i32 : i32 to vector<1x256xi32>
    %159 = arith.addi %13, %158 : vector<1x256xi32>
    %c0_i32_17 = arith.constant 0 : i32
    %160 = vector.broadcast %c0_i32_17 : i32 to vector<1x256xi32>
    %161 = arith.cmpi sge, %159, %160 : vector<1x256xi32>
    %cst_18 = arith.constant 0.000000e+00 : f32
    %162 = vector.broadcast %cst_18 : f32 to vector<1x256xf32>
    %163 = arith.select %161, %157, %162 : vector<1x256xi1>, vector<1x256xf32>
    %164 = arith.addf %88, %163 : vector<1x256xf32>
    %c2 = arith.constant 2 : index
    %165 = memref.load %arg1[%c2] : memref<98xf32, #tpu.memory_space<smem>>
    %166 = vector.extract_strided_slice %11 {offsets = [0, 2], sizes = [1, 256], strides = [1, 1]} : vector<1x358xf32> to vector<1x256xf32>
    %167 = vector.broadcast %165 : f32 to vector<1x256xf32>
    %168 = arith.mulf %167, %166 : vector<1x256xf32>
    %c51_19 = arith.constant 51 : index
    %169 = memref.load %arg1[%c51_19] : memref<98xf32, #tpu.memory_space<smem>>
    %170 = vector.extract_strided_slice %12 {offsets = [0, 2], sizes = [1, 256], strides = [1, 1]} : vector<1x358xf32> to vector<1x256xf32>
    %171 = vector.broadcast %169 : f32 to vector<1x256xf32>
    %172 = arith.mulf %171, %170 : vector<1x256xf32>
    %173 = arith.addf %168, %172 : vector<1x256xf32>
    %c9 = arith.constant 9 : index
    %174 = memref.load %arg1[%c9] : memref<98xf32, #tpu.memory_space<smem>>
    %175 = vector.extract_strided_slice %11 {offsets = [0, 18], sizes = [1, 256], strides = [1, 1]} : vector<1x358xf32> to vector<1x256xf32>
    %176 = vector.broadcast %174 : f32 to vector<1x256xf32>
    %177 = arith.mulf %176, %175 : vector<1x256xf32>
    %c58 = arith.constant 58 : index
    %178 = memref.load %arg1[%c58] : memref<98xf32, #tpu.memory_space<smem>>
    %179 = vector.extract_strided_slice %12 {offsets = [0, 18], sizes = [1, 256], strides = [1, 1]} : vector<1x358xf32> to vector<1x256xf32>
    %180 = vector.broadcast %178 : f32 to vector<1x256xf32>
    %181 = arith.mulf %180, %179 : vector<1x256xf32>
    %182 = arith.addf %177, %181 : vector<1x256xf32>
    %183 = arith.addf %173, %182 : vector<1x256xf32>
    %c16 = arith.constant 16 : index
    %184 = memref.load %arg1[%c16] : memref<98xf32, #tpu.memory_space<smem>>
    %185 = vector.extract_strided_slice %11 {offsets = [0, 34], sizes = [1, 256], strides = [1, 1]} : vector<1x358xf32> to vector<1x256xf32>
    %186 = vector.broadcast %184 : f32 to vector<1x256xf32>
    %187 = arith.mulf %186, %185 : vector<1x256xf32>
    %c65 = arith.constant 65 : index
    %188 = memref.load %arg1[%c65] : memref<98xf32, #tpu.memory_space<smem>>
    %189 = vector.extract_strided_slice %12 {offsets = [0, 34], sizes = [1, 256], strides = [1, 1]} : vector<1x358xf32> to vector<1x256xf32>
    %190 = vector.broadcast %188 : f32 to vector<1x256xf32>
    %191 = arith.mulf %190, %189 : vector<1x256xf32>
    %192 = arith.addf %187, %191 : vector<1x256xf32>
    %193 = arith.addf %183, %192 : vector<1x256xf32>
    %c23 = arith.constant 23 : index
    %194 = memref.load %arg1[%c23] : memref<98xf32, #tpu.memory_space<smem>>
    %195 = vector.extract_strided_slice %11 {offsets = [0, 50], sizes = [1, 256], strides = [1, 1]} : vector<1x358xf32> to vector<1x256xf32>
    %196 = vector.broadcast %194 : f32 to vector<1x256xf32>
    %197 = arith.mulf %196, %195 : vector<1x256xf32>
    %c72 = arith.constant 72 : index
    %198 = memref.load %arg1[%c72] : memref<98xf32, #tpu.memory_space<smem>>
    %199 = vector.extract_strided_slice %12 {offsets = [0, 50], sizes = [1, 256], strides = [1, 1]} : vector<1x358xf32> to vector<1x256xf32>
    %200 = vector.broadcast %198 : f32 to vector<1x256xf32>
    %201 = arith.mulf %200, %199 : vector<1x256xf32>
    %202 = arith.addf %197, %201 : vector<1x256xf32>
    %203 = arith.addf %193, %202 : vector<1x256xf32>
    %c30 = arith.constant 30 : index
    %204 = memref.load %arg1[%c30] : memref<98xf32, #tpu.memory_space<smem>>
    %205 = vector.extract_strided_slice %11 {offsets = [0, 66], sizes = [1, 256], strides = [1, 1]} : vector<1x358xf32> to vector<1x256xf32>
    %206 = vector.broadcast %204 : f32 to vector<1x256xf32>
    %207 = arith.mulf %206, %205 : vector<1x256xf32>
    %c79 = arith.constant 79 : index
    %208 = memref.load %arg1[%c79] : memref<98xf32, #tpu.memory_space<smem>>
    %209 = vector.extract_strided_slice %12 {offsets = [0, 66], sizes = [1, 256], strides = [1, 1]} : vector<1x358xf32> to vector<1x256xf32>
    %210 = vector.broadcast %208 : f32 to vector<1x256xf32>
    %211 = arith.mulf %210, %209 : vector<1x256xf32>
    %212 = arith.addf %207, %211 : vector<1x256xf32>
    %213 = arith.addf %203, %212 : vector<1x256xf32>
    %c37 = arith.constant 37 : index
    %214 = memref.load %arg1[%c37] : memref<98xf32, #tpu.memory_space<smem>>
    %215 = vector.extract_strided_slice %11 {offsets = [0, 82], sizes = [1, 256], strides = [1, 1]} : vector<1x358xf32> to vector<1x256xf32>
    %216 = vector.broadcast %214 : f32 to vector<1x256xf32>
    %217 = arith.mulf %216, %215 : vector<1x256xf32>
    %c86 = arith.constant 86 : index
    %218 = memref.load %arg1[%c86] : memref<98xf32, #tpu.memory_space<smem>>
    %219 = vector.extract_strided_slice %12 {offsets = [0, 82], sizes = [1, 256], strides = [1, 1]} : vector<1x358xf32> to vector<1x256xf32>
    %220 = vector.broadcast %218 : f32 to vector<1x256xf32>
    %221 = arith.mulf %220, %219 : vector<1x256xf32>
    %222 = arith.addf %217, %221 : vector<1x256xf32>
    %223 = arith.addf %213, %222 : vector<1x256xf32>
    %c44 = arith.constant 44 : index
    %224 = memref.load %arg1[%c44] : memref<98xf32, #tpu.memory_space<smem>>
    %225 = vector.extract_strided_slice %11 {offsets = [0, 98], sizes = [1, 256], strides = [1, 1]} : vector<1x358xf32> to vector<1x256xf32>
    %226 = vector.broadcast %224 : f32 to vector<1x256xf32>
    %227 = arith.mulf %226, %225 : vector<1x256xf32>
    %c93 = arith.constant 93 : index
    %228 = memref.load %arg1[%c93] : memref<98xf32, #tpu.memory_space<smem>>
    %229 = vector.extract_strided_slice %12 {offsets = [0, 98], sizes = [1, 256], strides = [1, 1]} : vector<1x358xf32> to vector<1x256xf32>
    %230 = vector.broadcast %228 : f32 to vector<1x256xf32>
    %231 = arith.mulf %230, %229 : vector<1x256xf32>
    %232 = arith.addf %227, %231 : vector<1x256xf32>
    %233 = arith.addf %223, %232 : vector<1x256xf32>
    %c-1_i32 = arith.constant -1 : i32
    %234 = vector.broadcast %c-1_i32 : i32 to vector<1x256xi32>
    %235 = arith.addi %13, %234 : vector<1x256xi32>
    %c0_i32_20 = arith.constant 0 : i32
    %236 = vector.broadcast %c0_i32_20 : i32 to vector<1x256xi32>
    %237 = arith.cmpi sge, %235, %236 : vector<1x256xi32>
    %cst_21 = arith.constant 0.000000e+00 : f32
    %238 = vector.broadcast %cst_21 : f32 to vector<1x256xf32>
    %239 = arith.select %237, %233, %238 : vector<1x256xi1>, vector<1x256xf32>
    %240 = arith.addf %164, %239 : vector<1x256xf32>
    %c3 = arith.constant 3 : index
    %241 = memref.load %arg1[%c3] : memref<98xf32, #tpu.memory_space<smem>>
    %242 = vector.extract_strided_slice %11 {offsets = [0, 3], sizes = [1, 256], strides = [1, 1]} : vector<1x358xf32> to vector<1x256xf32>
    %243 = vector.broadcast %241 : f32 to vector<1x256xf32>
    %244 = arith.mulf %243, %242 : vector<1x256xf32>
    %c52 = arith.constant 52 : index
    %245 = memref.load %arg1[%c52] : memref<98xf32, #tpu.memory_space<smem>>
    %246 = vector.extract_strided_slice %12 {offsets = [0, 3], sizes = [1, 256], strides = [1, 1]} : vector<1x358xf32> to vector<1x256xf32>
    %247 = vector.broadcast %245 : f32 to vector<1x256xf32>
    %248 = arith.mulf %247, %246 : vector<1x256xf32>
    %249 = arith.addf %244, %248 : vector<1x256xf32>
    %c10 = arith.constant 10 : index
    %250 = memref.load %arg1[%c10] : memref<98xf32, #tpu.memory_space<smem>>
    %251 = vector.extract_strided_slice %11 {offsets = [0, 19], sizes = [1, 256], strides = [1, 1]} : vector<1x358xf32> to vector<1x256xf32>
    %252 = vector.broadcast %250 : f32 to vector<1x256xf32>
    %253 = arith.mulf %252, %251 : vector<1x256xf32>
    %c59 = arith.constant 59 : index
    %254 = memref.load %arg1[%c59] : memref<98xf32, #tpu.memory_space<smem>>
    %255 = vector.extract_strided_slice %12 {offsets = [0, 19], sizes = [1, 256], strides = [1, 1]} : vector<1x358xf32> to vector<1x256xf32>
    %256 = vector.broadcast %254 : f32 to vector<1x256xf32>
    %257 = arith.mulf %256, %255 : vector<1x256xf32>
    %258 = arith.addf %253, %257 : vector<1x256xf32>
    %259 = arith.addf %249, %258 : vector<1x256xf32>
    %c17 = arith.constant 17 : index
    %260 = memref.load %arg1[%c17] : memref<98xf32, #tpu.memory_space<smem>>
    %261 = vector.extract_strided_slice %11 {offsets = [0, 35], sizes = [1, 256], strides = [1, 1]} : vector<1x358xf32> to vector<1x256xf32>
    %262 = vector.broadcast %260 : f32 to vector<1x256xf32>
    %263 = arith.mulf %262, %261 : vector<1x256xf32>
    %c66 = arith.constant 66 : index
    %264 = memref.load %arg1[%c66] : memref<98xf32, #tpu.memory_space<smem>>
    %265 = vector.extract_strided_slice %12 {offsets = [0, 35], sizes = [1, 256], strides = [1, 1]} : vector<1x358xf32> to vector<1x256xf32>
    %266 = vector.broadcast %264 : f32 to vector<1x256xf32>
    %267 = arith.mulf %266, %265 : vector<1x256xf32>
    %268 = arith.addf %263, %267 : vector<1x256xf32>
    %269 = arith.addf %259, %268 : vector<1x256xf32>
    %c24 = arith.constant 24 : index
    %270 = memref.load %arg1[%c24] : memref<98xf32, #tpu.memory_space<smem>>
    %271 = vector.extract_strided_slice %11 {offsets = [0, 51], sizes = [1, 256], strides = [1, 1]} : vector<1x358xf32> to vector<1x256xf32>
    %272 = vector.broadcast %270 : f32 to vector<1x256xf32>
    %273 = arith.mulf %272, %271 : vector<1x256xf32>
    %c73 = arith.constant 73 : index
    %274 = memref.load %arg1[%c73] : memref<98xf32, #tpu.memory_space<smem>>
    %275 = vector.extract_strided_slice %12 {offsets = [0, 51], sizes = [1, 256], strides = [1, 1]} : vector<1x358xf32> to vector<1x256xf32>
    %276 = vector.broadcast %274 : f32 to vector<1x256xf32>
    %277 = arith.mulf %276, %275 : vector<1x256xf32>
    %278 = arith.addf %273, %277 : vector<1x256xf32>
    %279 = arith.addf %269, %278 : vector<1x256xf32>
    %c31 = arith.constant 31 : index
    %280 = memref.load %arg1[%c31] : memref<98xf32, #tpu.memory_space<smem>>
    %281 = vector.extract_strided_slice %11 {offsets = [0, 67], sizes = [1, 256], strides = [1, 1]} : vector<1x358xf32> to vector<1x256xf32>
    %282 = vector.broadcast %280 : f32 to vector<1x256xf32>
    %283 = arith.mulf %282, %281 : vector<1x256xf32>
    %c80 = arith.constant 80 : index
    %284 = memref.load %arg1[%c80] : memref<98xf32, #tpu.memory_space<smem>>
    %285 = vector.extract_strided_slice %12 {offsets = [0, 67], sizes = [1, 256], strides = [1, 1]} : vector<1x358xf32> to vector<1x256xf32>
    %286 = vector.broadcast %284 : f32 to vector<1x256xf32>
    %287 = arith.mulf %286, %285 : vector<1x256xf32>
    %288 = arith.addf %283, %287 : vector<1x256xf32>
    %289 = arith.addf %279, %288 : vector<1x256xf32>
    %c38 = arith.constant 38 : index
    %290 = memref.load %arg1[%c38] : memref<98xf32, #tpu.memory_space<smem>>
    %291 = vector.extract_strided_slice %11 {offsets = [0, 83], sizes = [1, 256], strides = [1, 1]} : vector<1x358xf32> to vector<1x256xf32>
    %292 = vector.broadcast %290 : f32 to vector<1x256xf32>
    %293 = arith.mulf %292, %291 : vector<1x256xf32>
    %c87 = arith.constant 87 : index
    %294 = memref.load %arg1[%c87] : memref<98xf32, #tpu.memory_space<smem>>
    %295 = vector.extract_strided_slice %12 {offsets = [0, 83], sizes = [1, 256], strides = [1, 1]} : vector<1x358xf32> to vector<1x256xf32>
    %296 = vector.broadcast %294 : f32 to vector<1x256xf32>
    %297 = arith.mulf %296, %295 : vector<1x256xf32>
    %298 = arith.addf %293, %297 : vector<1x256xf32>
    %299 = arith.addf %289, %298 : vector<1x256xf32>
    %c45 = arith.constant 45 : index
    %300 = memref.load %arg1[%c45] : memref<98xf32, #tpu.memory_space<smem>>
    %301 = vector.extract_strided_slice %11 {offsets = [0, 99], sizes = [1, 256], strides = [1, 1]} : vector<1x358xf32> to vector<1x256xf32>
    %302 = vector.broadcast %300 : f32 to vector<1x256xf32>
    %303 = arith.mulf %302, %301 : vector<1x256xf32>
    %c94 = arith.constant 94 : index
    %304 = memref.load %arg1[%c94] : memref<98xf32, #tpu.memory_space<smem>>
    %305 = vector.extract_strided_slice %12 {offsets = [0, 99], sizes = [1, 256], strides = [1, 1]} : vector<1x358xf32> to vector<1x256xf32>
    %306 = vector.broadcast %304 : f32 to vector<1x256xf32>
    %307 = arith.mulf %306, %305 : vector<1x256xf32>
    %308 = arith.addf %303, %307 : vector<1x256xf32>
    %309 = arith.addf %299, %308 : vector<1x256xf32>
    %310 = arith.addf %240, %309 : vector<1x256xf32>
    %c4 = arith.constant 4 : index
    %311 = memref.load %arg1[%c4] : memref<98xf32, #tpu.memory_space<smem>>
    %312 = vector.extract_strided_slice %11 {offsets = [0, 4], sizes = [1, 256], strides = [1, 1]} : vector<1x358xf32> to vector<1x256xf32>
    %313 = vector.broadcast %311 : f32 to vector<1x256xf32>
    %314 = arith.mulf %313, %312 : vector<1x256xf32>
    %c53 = arith.constant 53 : index
    %315 = memref.load %arg1[%c53] : memref<98xf32, #tpu.memory_space<smem>>
    %316 = vector.extract_strided_slice %12 {offsets = [0, 4], sizes = [1, 256], strides = [1, 1]} : vector<1x358xf32> to vector<1x256xf32>
    %317 = vector.broadcast %315 : f32 to vector<1x256xf32>
    %318 = arith.mulf %317, %316 : vector<1x256xf32>
    %319 = arith.addf %314, %318 : vector<1x256xf32>
    %c11 = arith.constant 11 : index
    %320 = memref.load %arg1[%c11] : memref<98xf32, #tpu.memory_space<smem>>
    %321 = vector.extract_strided_slice %11 {offsets = [0, 20], sizes = [1, 256], strides = [1, 1]} : vector<1x358xf32> to vector<1x256xf32>
    %322 = vector.broadcast %320 : f32 to vector<1x256xf32>
    %323 = arith.mulf %322, %321 : vector<1x256xf32>
    %c60 = arith.constant 60 : index
    %324 = memref.load %arg1[%c60] : memref<98xf32, #tpu.memory_space<smem>>
    %325 = vector.extract_strided_slice %12 {offsets = [0, 20], sizes = [1, 256], strides = [1, 1]} : vector<1x358xf32> to vector<1x256xf32>
    %326 = vector.broadcast %324 : f32 to vector<1x256xf32>
    %327 = arith.mulf %326, %325 : vector<1x256xf32>
    %328 = arith.addf %323, %327 : vector<1x256xf32>
    %329 = arith.addf %319, %328 : vector<1x256xf32>
    %c18 = arith.constant 18 : index
    %330 = memref.load %arg1[%c18] : memref<98xf32, #tpu.memory_space<smem>>
    %331 = vector.extract_strided_slice %11 {offsets = [0, 36], sizes = [1, 256], strides = [1, 1]} : vector<1x358xf32> to vector<1x256xf32>
    %332 = vector.broadcast %330 : f32 to vector<1x256xf32>
    %333 = arith.mulf %332, %331 : vector<1x256xf32>
    %c67 = arith.constant 67 : index
    %334 = memref.load %arg1[%c67] : memref<98xf32, #tpu.memory_space<smem>>
    %335 = vector.extract_strided_slice %12 {offsets = [0, 36], sizes = [1, 256], strides = [1, 1]} : vector<1x358xf32> to vector<1x256xf32>
    %336 = vector.broadcast %334 : f32 to vector<1x256xf32>
    %337 = arith.mulf %336, %335 : vector<1x256xf32>
    %338 = arith.addf %333, %337 : vector<1x256xf32>
    %339 = arith.addf %329, %338 : vector<1x256xf32>
    %c25 = arith.constant 25 : index
    %340 = memref.load %arg1[%c25] : memref<98xf32, #tpu.memory_space<smem>>
    %341 = vector.extract_strided_slice %11 {offsets = [0, 52], sizes = [1, 256], strides = [1, 1]} : vector<1x358xf32> to vector<1x256xf32>
    %342 = vector.broadcast %340 : f32 to vector<1x256xf32>
    %343 = arith.mulf %342, %341 : vector<1x256xf32>
    %c74 = arith.constant 74 : index
    %344 = memref.load %arg1[%c74] : memref<98xf32, #tpu.memory_space<smem>>
    %345 = vector.extract_strided_slice %12 {offsets = [0, 52], sizes = [1, 256], strides = [1, 1]} : vector<1x358xf32> to vector<1x256xf32>
    %346 = vector.broadcast %344 : f32 to vector<1x256xf32>
    %347 = arith.mulf %346, %345 : vector<1x256xf32>
    %348 = arith.addf %343, %347 : vector<1x256xf32>
    %349 = arith.addf %339, %348 : vector<1x256xf32>
    %c32 = arith.constant 32 : index
    %350 = memref.load %arg1[%c32] : memref<98xf32, #tpu.memory_space<smem>>
    %351 = vector.extract_strided_slice %11 {offsets = [0, 68], sizes = [1, 256], strides = [1, 1]} : vector<1x358xf32> to vector<1x256xf32>
    %352 = vector.broadcast %350 : f32 to vector<1x256xf32>
    %353 = arith.mulf %352, %351 : vector<1x256xf32>
    %c81 = arith.constant 81 : index
    %354 = memref.load %arg1[%c81] : memref<98xf32, #tpu.memory_space<smem>>
    %355 = vector.extract_strided_slice %12 {offsets = [0, 68], sizes = [1, 256], strides = [1, 1]} : vector<1x358xf32> to vector<1x256xf32>
    %356 = vector.broadcast %354 : f32 to vector<1x256xf32>
    %357 = arith.mulf %356, %355 : vector<1x256xf32>
    %358 = arith.addf %353, %357 : vector<1x256xf32>
    %359 = arith.addf %349, %358 : vector<1x256xf32>
    %c39 = arith.constant 39 : index
    %360 = memref.load %arg1[%c39] : memref<98xf32, #tpu.memory_space<smem>>
    %361 = vector.extract_strided_slice %11 {offsets = [0, 84], sizes = [1, 256], strides = [1, 1]} : vector<1x358xf32> to vector<1x256xf32>
    %362 = vector.broadcast %360 : f32 to vector<1x256xf32>
    %363 = arith.mulf %362, %361 : vector<1x256xf32>
    %c88 = arith.constant 88 : index
    %364 = memref.load %arg1[%c88] : memref<98xf32, #tpu.memory_space<smem>>
    %365 = vector.extract_strided_slice %12 {offsets = [0, 84], sizes = [1, 256], strides = [1, 1]} : vector<1x358xf32> to vector<1x256xf32>
    %366 = vector.broadcast %364 : f32 to vector<1x256xf32>
    %367 = arith.mulf %366, %365 : vector<1x256xf32>
    %368 = arith.addf %363, %367 : vector<1x256xf32>
    %369 = arith.addf %359, %368 : vector<1x256xf32>
    %c46 = arith.constant 46 : index
    %370 = memref.load %arg1[%c46] : memref<98xf32, #tpu.memory_space<smem>>
    %371 = vector.extract_strided_slice %11 {offsets = [0, 100], sizes = [1, 256], strides = [1, 1]} : vector<1x358xf32> to vector<1x256xf32>
    %372 = vector.broadcast %370 : f32 to vector<1x256xf32>
    %373 = arith.mulf %372, %371 : vector<1x256xf32>
    %c95 = arith.constant 95 : index
    %374 = memref.load %arg1[%c95] : memref<98xf32, #tpu.memory_space<smem>>
    %375 = vector.extract_strided_slice %12 {offsets = [0, 100], sizes = [1, 256], strides = [1, 1]} : vector<1x358xf32> to vector<1x256xf32>
    %376 = vector.broadcast %374 : f32 to vector<1x256xf32>
    %377 = arith.mulf %376, %375 : vector<1x256xf32>
    %378 = arith.addf %373, %377 : vector<1x256xf32>
    %379 = arith.addf %369, %378 : vector<1x256xf32>
    %c1_i32 = arith.constant 1 : i32
    %380 = vector.broadcast %c1_i32 : i32 to vector<1x256xi32>
    %381 = arith.addi %13, %380 : vector<1x256xi32>
    %c16_i32 = arith.constant 16 : i32
    %382 = vector.broadcast %c16_i32 : i32 to vector<1x256xi32>
    %383 = arith.cmpi slt, %381, %382 : vector<1x256xi32>
    %cst_22 = arith.constant 0.000000e+00 : f32
    %384 = vector.broadcast %cst_22 : f32 to vector<1x256xf32>
    %385 = arith.select %383, %379, %384 : vector<1x256xi1>, vector<1x256xf32>
    %386 = arith.addf %310, %385 : vector<1x256xf32>
    %c5 = arith.constant 5 : index
    %387 = memref.load %arg1[%c5] : memref<98xf32, #tpu.memory_space<smem>>
    %388 = vector.extract_strided_slice %11 {offsets = [0, 5], sizes = [1, 256], strides = [1, 1]} : vector<1x358xf32> to vector<1x256xf32>
    %389 = vector.broadcast %387 : f32 to vector<1x256xf32>
    %390 = arith.mulf %389, %388 : vector<1x256xf32>
    %c54 = arith.constant 54 : index
    %391 = memref.load %arg1[%c54] : memref<98xf32, #tpu.memory_space<smem>>
    %392 = vector.extract_strided_slice %12 {offsets = [0, 5], sizes = [1, 256], strides = [1, 1]} : vector<1x358xf32> to vector<1x256xf32>
    %393 = vector.broadcast %391 : f32 to vector<1x256xf32>
    %394 = arith.mulf %393, %392 : vector<1x256xf32>
    %395 = arith.addf %390, %394 : vector<1x256xf32>
    %c12 = arith.constant 12 : index
    %396 = memref.load %arg1[%c12] : memref<98xf32, #tpu.memory_space<smem>>
    %397 = vector.extract_strided_slice %11 {offsets = [0, 21], sizes = [1, 256], strides = [1, 1]} : vector<1x358xf32> to vector<1x256xf32>
    %398 = vector.broadcast %396 : f32 to vector<1x256xf32>
    %399 = arith.mulf %398, %397 : vector<1x256xf32>
    %c61 = arith.constant 61 : index
    %400 = memref.load %arg1[%c61] : memref<98xf32, #tpu.memory_space<smem>>
    %401 = vector.extract_strided_slice %12 {offsets = [0, 21], sizes = [1, 256], strides = [1, 1]} : vector<1x358xf32> to vector<1x256xf32>
    %402 = vector.broadcast %400 : f32 to vector<1x256xf32>
    %403 = arith.mulf %402, %401 : vector<1x256xf32>
    %404 = arith.addf %399, %403 : vector<1x256xf32>
    %405 = arith.addf %395, %404 : vector<1x256xf32>
    %c19 = arith.constant 19 : index
    %406 = memref.load %arg1[%c19] : memref<98xf32, #tpu.memory_space<smem>>
    %407 = vector.extract_strided_slice %11 {offsets = [0, 37], sizes = [1, 256], strides = [1, 1]} : vector<1x358xf32> to vector<1x256xf32>
    %408 = vector.broadcast %406 : f32 to vector<1x256xf32>
    %409 = arith.mulf %408, %407 : vector<1x256xf32>
    %c68 = arith.constant 68 : index
    %410 = memref.load %arg1[%c68] : memref<98xf32, #tpu.memory_space<smem>>
    %411 = vector.extract_strided_slice %12 {offsets = [0, 37], sizes = [1, 256], strides = [1, 1]} : vector<1x358xf32> to vector<1x256xf32>
    %412 = vector.broadcast %410 : f32 to vector<1x256xf32>
    %413 = arith.mulf %412, %411 : vector<1x256xf32>
    %414 = arith.addf %409, %413 : vector<1x256xf32>
    %415 = arith.addf %405, %414 : vector<1x256xf32>
    %c26 = arith.constant 26 : index
    %416 = memref.load %arg1[%c26] : memref<98xf32, #tpu.memory_space<smem>>
    %417 = vector.extract_strided_slice %11 {offsets = [0, 53], sizes = [1, 256], strides = [1, 1]} : vector<1x358xf32> to vector<1x256xf32>
    %418 = vector.broadcast %416 : f32 to vector<1x256xf32>
    %419 = arith.mulf %418, %417 : vector<1x256xf32>
    %c75 = arith.constant 75 : index
    %420 = memref.load %arg1[%c75] : memref<98xf32, #tpu.memory_space<smem>>
    %421 = vector.extract_strided_slice %12 {offsets = [0, 53], sizes = [1, 256], strides = [1, 1]} : vector<1x358xf32> to vector<1x256xf32>
    %422 = vector.broadcast %420 : f32 to vector<1x256xf32>
    %423 = arith.mulf %422, %421 : vector<1x256xf32>
    %424 = arith.addf %419, %423 : vector<1x256xf32>
    %425 = arith.addf %415, %424 : vector<1x256xf32>
    %c33 = arith.constant 33 : index
    %426 = memref.load %arg1[%c33] : memref<98xf32, #tpu.memory_space<smem>>
    %427 = vector.extract_strided_slice %11 {offsets = [0, 69], sizes = [1, 256], strides = [1, 1]} : vector<1x358xf32> to vector<1x256xf32>
    %428 = vector.broadcast %426 : f32 to vector<1x256xf32>
    %429 = arith.mulf %428, %427 : vector<1x256xf32>
    %c82 = arith.constant 82 : index
    %430 = memref.load %arg1[%c82] : memref<98xf32, #tpu.memory_space<smem>>
    %431 = vector.extract_strided_slice %12 {offsets = [0, 69], sizes = [1, 256], strides = [1, 1]} : vector<1x358xf32> to vector<1x256xf32>
    %432 = vector.broadcast %430 : f32 to vector<1x256xf32>
    %433 = arith.mulf %432, %431 : vector<1x256xf32>
    %434 = arith.addf %429, %433 : vector<1x256xf32>
    %435 = arith.addf %425, %434 : vector<1x256xf32>
    %c40 = arith.constant 40 : index
    %436 = memref.load %arg1[%c40] : memref<98xf32, #tpu.memory_space<smem>>
    %437 = vector.extract_strided_slice %11 {offsets = [0, 85], sizes = [1, 256], strides = [1, 1]} : vector<1x358xf32> to vector<1x256xf32>
    %438 = vector.broadcast %436 : f32 to vector<1x256xf32>
    %439 = arith.mulf %438, %437 : vector<1x256xf32>
    %c89 = arith.constant 89 : index
    %440 = memref.load %arg1[%c89] : memref<98xf32, #tpu.memory_space<smem>>
    %441 = vector.extract_strided_slice %12 {offsets = [0, 85], sizes = [1, 256], strides = [1, 1]} : vector<1x358xf32> to vector<1x256xf32>
    %442 = vector.broadcast %440 : f32 to vector<1x256xf32>
    %443 = arith.mulf %442, %441 : vector<1x256xf32>
    %444 = arith.addf %439, %443 : vector<1x256xf32>
    %445 = arith.addf %435, %444 : vector<1x256xf32>
    %c47 = arith.constant 47 : index
    %446 = memref.load %arg1[%c47] : memref<98xf32, #tpu.memory_space<smem>>
    %447 = vector.extract_strided_slice %11 {offsets = [0, 101], sizes = [1, 256], strides = [1, 1]} : vector<1x358xf32> to vector<1x256xf32>
    %448 = vector.broadcast %446 : f32 to vector<1x256xf32>
    %449 = arith.mulf %448, %447 : vector<1x256xf32>
    %c96 = arith.constant 96 : index
    %450 = memref.load %arg1[%c96] : memref<98xf32, #tpu.memory_space<smem>>
    %451 = vector.extract_strided_slice %12 {offsets = [0, 101], sizes = [1, 256], strides = [1, 1]} : vector<1x358xf32> to vector<1x256xf32>
    %452 = vector.broadcast %450 : f32 to vector<1x256xf32>
    %453 = arith.mulf %452, %451 : vector<1x256xf32>
    %454 = arith.addf %449, %453 : vector<1x256xf32>
    %455 = arith.addf %445, %454 : vector<1x256xf32>
    %c2_i32 = arith.constant 2 : i32
    %456 = vector.broadcast %c2_i32 : i32 to vector<1x256xi32>
    %457 = arith.addi %13, %456 : vector<1x256xi32>
    %c16_i32_23 = arith.constant 16 : i32
    %458 = vector.broadcast %c16_i32_23 : i32 to vector<1x256xi32>
    %459 = arith.cmpi slt, %457, %458 : vector<1x256xi32>
    %cst_24 = arith.constant 0.000000e+00 : f32
    %460 = vector.broadcast %cst_24 : f32 to vector<1x256xf32>
    %461 = arith.select %459, %455, %460 : vector<1x256xi1>, vector<1x256xf32>
    %462 = arith.addf %386, %461 : vector<1x256xf32>
    %c6 = arith.constant 6 : index
    %463 = memref.load %arg1[%c6] : memref<98xf32, #tpu.memory_space<smem>>
    %464 = vector.extract_strided_slice %11 {offsets = [0, 6], sizes = [1, 256], strides = [1, 1]} : vector<1x358xf32> to vector<1x256xf32>
    %465 = vector.broadcast %463 : f32 to vector<1x256xf32>
    %466 = arith.mulf %465, %464 : vector<1x256xf32>
    %c55 = arith.constant 55 : index
    %467 = memref.load %arg1[%c55] : memref<98xf32, #tpu.memory_space<smem>>
    %468 = vector.extract_strided_slice %12 {offsets = [0, 6], sizes = [1, 256], strides = [1, 1]} : vector<1x358xf32> to vector<1x256xf32>
    %469 = vector.broadcast %467 : f32 to vector<1x256xf32>
    %470 = arith.mulf %469, %468 : vector<1x256xf32>
    %471 = arith.addf %466, %470 : vector<1x256xf32>
    %c13 = arith.constant 13 : index
    %472 = memref.load %arg1[%c13] : memref<98xf32, #tpu.memory_space<smem>>
    %473 = vector.extract_strided_slice %11 {offsets = [0, 22], sizes = [1, 256], strides = [1, 1]} : vector<1x358xf32> to vector<1x256xf32>
    %474 = vector.broadcast %472 : f32 to vector<1x256xf32>
    %475 = arith.mulf %474, %473 : vector<1x256xf32>
    %c62 = arith.constant 62 : index
    %476 = memref.load %arg1[%c62] : memref<98xf32, #tpu.memory_space<smem>>
    %477 = vector.extract_strided_slice %12 {offsets = [0, 22], sizes = [1, 256], strides = [1, 1]} : vector<1x358xf32> to vector<1x256xf32>
    %478 = vector.broadcast %476 : f32 to vector<1x256xf32>
    %479 = arith.mulf %478, %477 : vector<1x256xf32>
    %480 = arith.addf %475, %479 : vector<1x256xf32>
    %481 = arith.addf %471, %480 : vector<1x256xf32>
    %c20 = arith.constant 20 : index
    %482 = memref.load %arg1[%c20] : memref<98xf32, #tpu.memory_space<smem>>
    %483 = vector.extract_strided_slice %11 {offsets = [0, 38], sizes = [1, 256], strides = [1, 1]} : vector<1x358xf32> to vector<1x256xf32>
    %484 = vector.broadcast %482 : f32 to vector<1x256xf32>
    %485 = arith.mulf %484, %483 : vector<1x256xf32>
    %c69 = arith.constant 69 : index
    %486 = memref.load %arg1[%c69] : memref<98xf32, #tpu.memory_space<smem>>
    %487 = vector.extract_strided_slice %12 {offsets = [0, 38], sizes = [1, 256], strides = [1, 1]} : vector<1x358xf32> to vector<1x256xf32>
    %488 = vector.broadcast %486 : f32 to vector<1x256xf32>
    %489 = arith.mulf %488, %487 : vector<1x256xf32>
    %490 = arith.addf %485, %489 : vector<1x256xf32>
    %491 = arith.addf %481, %490 : vector<1x256xf32>
    %c27 = arith.constant 27 : index
    %492 = memref.load %arg1[%c27] : memref<98xf32, #tpu.memory_space<smem>>
    %493 = vector.extract_strided_slice %11 {offsets = [0, 54], sizes = [1, 256], strides = [1, 1]} : vector<1x358xf32> to vector<1x256xf32>
    %494 = vector.broadcast %492 : f32 to vector<1x256xf32>
    %495 = arith.mulf %494, %493 : vector<1x256xf32>
    %c76 = arith.constant 76 : index
    %496 = memref.load %arg1[%c76] : memref<98xf32, #tpu.memory_space<smem>>
    %497 = vector.extract_strided_slice %12 {offsets = [0, 54], sizes = [1, 256], strides = [1, 1]} : vector<1x358xf32> to vector<1x256xf32>
    %498 = vector.broadcast %496 : f32 to vector<1x256xf32>
    %499 = arith.mulf %498, %497 : vector<1x256xf32>
    %500 = arith.addf %495, %499 : vector<1x256xf32>
    %501 = arith.addf %491, %500 : vector<1x256xf32>
    %c34 = arith.constant 34 : index
    %502 = memref.load %arg1[%c34] : memref<98xf32, #tpu.memory_space<smem>>
    %503 = vector.extract_strided_slice %11 {offsets = [0, 70], sizes = [1, 256], strides = [1, 1]} : vector<1x358xf32> to vector<1x256xf32>
    %504 = vector.broadcast %502 : f32 to vector<1x256xf32>
    %505 = arith.mulf %504, %503 : vector<1x256xf32>
    %c83 = arith.constant 83 : index
    %506 = memref.load %arg1[%c83] : memref<98xf32, #tpu.memory_space<smem>>
    %507 = vector.extract_strided_slice %12 {offsets = [0, 70], sizes = [1, 256], strides = [1, 1]} : vector<1x358xf32> to vector<1x256xf32>
    %508 = vector.broadcast %506 : f32 to vector<1x256xf32>
    %509 = arith.mulf %508, %507 : vector<1x256xf32>
    %510 = arith.addf %505, %509 : vector<1x256xf32>
    %511 = arith.addf %501, %510 : vector<1x256xf32>
    %c41 = arith.constant 41 : index
    %512 = memref.load %arg1[%c41] : memref<98xf32, #tpu.memory_space<smem>>
    %513 = vector.extract_strided_slice %11 {offsets = [0, 86], sizes = [1, 256], strides = [1, 1]} : vector<1x358xf32> to vector<1x256xf32>
    %514 = vector.broadcast %512 : f32 to vector<1x256xf32>
    %515 = arith.mulf %514, %513 : vector<1x256xf32>
    %c90 = arith.constant 90 : index
    %516 = memref.load %arg1[%c90] : memref<98xf32, #tpu.memory_space<smem>>
    %517 = vector.extract_strided_slice %12 {offsets = [0, 86], sizes = [1, 256], strides = [1, 1]} : vector<1x358xf32> to vector<1x256xf32>
    %518 = vector.broadcast %516 : f32 to vector<1x256xf32>
    %519 = arith.mulf %518, %517 : vector<1x256xf32>
    %520 = arith.addf %515, %519 : vector<1x256xf32>
    %521 = arith.addf %511, %520 : vector<1x256xf32>
    %c48 = arith.constant 48 : index
    %522 = memref.load %arg1[%c48] : memref<98xf32, #tpu.memory_space<smem>>
    %523 = vector.extract_strided_slice %11 {offsets = [0, 102], sizes = [1, 256], strides = [1, 1]} : vector<1x358xf32> to vector<1x256xf32>
    %524 = vector.broadcast %522 : f32 to vector<1x256xf32>
    %525 = arith.mulf %524, %523 : vector<1x256xf32>
    %c97 = arith.constant 97 : index
    %526 = memref.load %arg1[%c97] : memref<98xf32, #tpu.memory_space<smem>>
    %527 = vector.extract_strided_slice %12 {offsets = [0, 102], sizes = [1, 256], strides = [1, 1]} : vector<1x358xf32> to vector<1x256xf32>
    %528 = vector.broadcast %526 : f32 to vector<1x256xf32>
    %529 = arith.mulf %528, %527 : vector<1x256xf32>
    %530 = arith.addf %525, %529 : vector<1x256xf32>
    %531 = arith.addf %521, %530 : vector<1x256xf32>
    %c3_i32 = arith.constant 3 : i32
    %532 = vector.broadcast %c3_i32 : i32 to vector<1x256xi32>
    %533 = arith.addi %13, %532 : vector<1x256xi32>
    %c16_i32_25 = arith.constant 16 : i32
    %534 = vector.broadcast %c16_i32_25 : i32 to vector<1x256xi32>
    %535 = arith.cmpi slt, %533, %534 : vector<1x256xi32>
    %cst_26 = arith.constant 0.000000e+00 : f32
    %536 = vector.broadcast %cst_26 : f32 to vector<1x256xf32>
    %537 = arith.select %535, %531, %536 : vector<1x256xi1>, vector<1x256xf32>
    %538 = arith.addf %462, %537 : vector<1x256xf32>
    %539 = vector.shape_cast %538 : vector<1x256xf32> to vector<1x1x256xf32>
    %540 = vector.broadcast %539 : vector<1x1x256xf32> to vector<1x4x256xf32>
    %541 = arith.mulf %540, %0 : vector<1x4x256xf32>
    %c0_27 = arith.constant 0 : index
    %c0_28 = arith.constant 0 : index
    %c0_29 = arith.constant 0 : index
    %542 = vector.load %arg4[%c0_27, %c0_28, %c0_29] : memref<1x4x256xf32, #tpu.memory_space<vmem>>, vector<1x4x256xf32>
    tpu.vector_store %arg4[%c0_27, %c0_28, %c0_29], %541 {strides = array<i32>} : memref<1x4x256xf32, #tpu.memory_space<vmem>>, vector<1x4x256xf32>,
    return
  }
  func.func @transform_0(%arg0: i32) -> i32 {
    %c0_i32 = arith.constant 0 : i32
    %c0_i32_0 = arith.constant 0 : i32
    return %c0_i32 : i32
  }
  func.func @transform_1(%arg0: i32) -> (i32, i32) {
    %c0_i32 = arith.constant 0 : i32
    %c0_i32_0 = arith.constant 0 : i32
    %c0_i32_1 = arith.constant 0 : i32
    return %c0_i32, %c0_i32_0 : i32, i32
  }
  func.func @transform_2(%arg0: i32) -> (i32, i32, i32) {
    %c0_i32 = arith.constant 0 : i32
    %c0_i32_0 = arith.constant 0 : i32
    %c0_i32_1 = arith.constant 0 : i32
    return %arg0, %c0_i32, %c0_i32_0 : i32, i32, i32
  }
  func.func @transform_3(%arg0: i32) -> (i32, i32, i32) {
    %c0_i32 = arith.constant 0 : i32
    %c0_i32_0 = arith.constant 0 : i32
    %c0_i32_1 = arith.constant 0 : i32
    return %arg0, %c0_i32, %c0_i32_0 : i32, i32, i32
  }
}

</mosaic_0001>

<bundles_post_ra>
// kernel: tpu_custom_call.1
= control target key start
LH: loop header
LB: loop body
LE: loop exit
PB: predicated region body
PF: predicated region fallthrough
CT: control target
= control target key end

     0   :  { %s2534_s0 = inlined_call_operand.hbm [shape: f32[98], index: 0, kind: input, shape index: {}]   ;;  %s2535_s1 = inlined_call_operand.hbm [shape: s32[1,256], index: 1, kind: input, shape index: {}]   ;;  %s2536_s2 = inlined_call_operand.hbm [shape: f32[2,4,256], index: 2, kind: input, shape index: {}]   ;;  %s2537_s3 = inlined_call_operand.hbm [shape: f32[2,4,256], index: 3, kind: output, shape index: {}]  }
   0x1   :  { %2554 = sst [smem:[#allocation15_spill]] %s2534_s0 }
   0x2   :  { %8 = vsyncpa [#allocation6], 0 }
   0x3   :  { %9 = vsyncpa [#allocation4], 0 }
   0x4   :  { %10 = vsyncpa [#allocation9], 0 }
   0x5   :  { %12 = vsyncpa [#allocation9 + $0x1], 0 }
   0x6   :  { %13 = vsyncpa [#allocation5], 0 }
   0x7   :  { %15 = vsyncpa [#allocation5 + $0x1], 0  ;;  %s1817_s12 = smov 0   ;;  %s1819_s13 = smov 0  }
   0x8   :  { %s1821_s14 = smov 0   ;;  %s1823_s15 = smov 0  }
   0x9 LB: > { %s1838_s16 = sadd.s32 4294967295, %s1776_s15   ;;  %s1388_s17 = sadd.s32 4294967294, %s1776_s15   ;;  %s1776_s15 = sphi %s1823_s15, %s2586_s15   ;;  %s1772_s14 = sphi %s1821_s14, %s2585_s14   ;;  %s1768_s13 = sphi %s1819_s13, %s2584_s13   ;;  %s1764_s12 = sphi %s1817_s12, %s2583_s12  }
   0xa   : > { %p83_p0 = scmp.ne.s32.totalorder %s1768_s13, %s1764_s12  ;;  %p2538_p1 = scmp.eq.s32.totalorder %s1838_s16, 0 }
   0xb   : > { %p107_p2 = scmp.eq.s32.totalorder %s1838_s16, 1  ;;  %p113_p3 = scmp.eq.s32.totalorder %s1388_s17, 1 }
   0xc   : > { %p1847_p4 = por %p2538_p1, %p83_p0  ;;  %p1389_p5 = scmp.ge.s32.totalorder %s1776_s15, 1 }
   0xd   : > { %p1852_p6 = por %p113_p3, %p83_p0  ;;  %p120_p7 = scmp.lt.s32.totalorder %s1776_s15, 3 }
   0xe   : > { %s2555_s18 = scalar_select %p1847_p4, 1, 0 }
   0xf   : > { %s2556_s19 = scalar_select %p1852_p6, 1, 0 }
  0x10   : > { %p1857_p8 = pnand %p1389_p5, %p120_p7  ;;  %s1778_s21 = smov [#allocation7]  }
  0x11   : > { %s142_s22 = sshll.u32 %s1778_s21, 4  ;;  %s1871_s24 = sadd.s32 1, %s1776_s15   ;;  %s143_s22 = int_to_ptr.vmem [resolvable:$true] %s142_s22 }
  0x12   : > { %s2557_s20 = scalar_select %p1857_p8, 1, 0 }
  0x13   : > { %p1566_p10 = pneg %p1857_p8  ;;  %s67_s25 = ssub.s32 %s1776_s15, %s1871_s24 }
  0x14   : > { %s70_s26 = sadd.s32 1, %s1772_s14  ;;  %p1876_p12 = scmp.eq.s32.totalorder %s67_s25, 0 }
  0x15   : > { %p1866_p11 = pnand %p1566_p10, %p2538_p1  ;;  %s1779_s28 = smov [#allocation3]  }
  0x16   : > { %s2560_s0 = sld [smem:[#allocation15_spill]]  ;;  %s1661_s4 = scalar_lea.vmem %s143_s22, 32 }
  0x17   : > { %p1652_p13 = pneg %p1866_p11  ;;  %p1662_p0 = scmp.ne.s32.totalorder %s143_s22, %s1661_s4 }
  0x18   : > { %p1669_p7 = scmp.lt.s32.totalorder %s143_s22, %s143_s22  ;;  %p1670_p10 = scmp.lt.s32.totalorder %s1661_s4, %s1661_s4 }
  0x19   : > { %p1664_p3 = pnand %p1662_p0, %p1652_p13 }
  0x1a   : > { %p1671_p9 = por %p1670_p10, %p1669_p7 }
  0x1b   : > { %p1665_p5 = pneg %p1664_p3 }
  0x1c   : > { %1569 = dma.hbm_to_smem (!%p1866_p11), %s2560_s0, 16, %s1779_s28, [#allocation6]  }
  0x1d   : > { %p1672_p1 = pnand %p1671_p9, %p1665_p5 }
  0x1f   : > { %1675 = shalt.err (!%p1672_p1)
}
  0x20   : > { %1572 = dma.hbm_to_vmem [thread:$0]  (!%p1866_p11), %s2535_s1, 32, %s143_s22, [#allocation4]  }
  0x21   : > { %s1895_s7 = scalar_select %p1876_p12, %s1772_s14, %s70_s26  }
  0x22   : > { %p77_p9 = scmp.ne.s32.totalorder %s1772_s14, %s1768_s13  ;;  %p78_p1 = scmp.eq.s32.totalorder %s1776_s15, 0 }
  0x23   : > { %p1583_p13 = scmp.lt.s32.totalorder %s1776_s15, 2  ;;  %s153_s8 = sand.u32 1, %s1772_s14  }
  0x24   : > { %p79_p0 = por %p78_p1, %p77_p9  ;;  %p1904_p3 = por %p107_p2, %p77_p9 }
  0x25   : > { %s1393_s10 = sshll.u32 %s153_s8, 3  ;;  %s1552_s11 = sshll.u32 %s1776_s15, 7 }
  0x26   : > { %s2561_s9 = scalar_select %p1904_p3, 1, 0 }
  0x27   : > { %s1912_s23 = scalar_lea.hbm %s2536_s2, %s1552_s11  ;;  %s157_s22 = scalar_lea.vmem [#allocation8], %s1393_s10 }
  0x28   : > { %s165_s25 = sshll.u32 %s157_s22, 4  ;;  %p1914_p11 = pnand %p1583_p13, %p79_p0  ;;  %s166_s25 = int_to_ptr.vmem [resolvable:$true] %s165_s25 }
  0x29   : > { %s154_s27 = scalar_lea.sflag [#allocation9], %s153_s8  ;;  %s1676_s28 = scalar_lea.hbm %s1912_s23, 128 }
  0x2a   : > { %p1677_p2 = scmp.ne.s32.totalorder %s1912_s23, %s1676_s28  ;;  %p1678_p12 = pneg %p1914_p11 }
  0x2b   : > { %s1681_s4 = scalar_lea.hbm %s2536_s2, 256  ;;  %p1682_p10 = scmp.lt.s32.totalorder %s1912_s23, %s2536_s2 }
  0x2c   : > { %p1679_p5 = pnand %p1678_p12, %p1677_p2  ;;  %p1683_p9 = scmp.lt.s32.totalorder %s1681_s4, %s1676_s28 }
  0x2e   : > { %p1680_p7 = pneg %p1679_p5  ;;  %p1684_p1 = por %p1683_p9, %p1682_p10 }
  0x30   : > { %p1685_p13 = pnand %p1684_p1, %p1680_p7 }
  0x32   : > { %1688 = shalt.err (!%p1685_p13)
}
  0x33   : > { %s1689_s10 = scalar_lea.vmem %s166_s25, 128  ;;  %s1780_s8 = smov [#allocation8]  }
  0x34   : > { %p1690_p0 = scmp.ne.s32.totalorder %s166_s25, %s1689_s10  ;;  %s1694_s11 = sshll.u32 %s1780_s8, 4  ;;  %s1695_s11 = int_to_ptr.vmem [resolvable:$false] %s1694_s11 }
  0x35   : > { %s1696_s17 = scalar_lea.vmem %s1695_s11, 256  ;;  %p1697_p2 = scmp.lt.s32.totalorder %s166_s25, %s1695_s11 }
  0x36   : > { %p1692_p6 = pnand %p1690_p0, %p1678_p12  ;;  %p1698_p5 = scmp.lt.s32.totalorder %s1696_s17, %s1689_s10 }
  0x38   : > { %p1693_p3 = pneg %p1692_p6  ;;  %p1699_p4 = por %p1698_p5, %p1697_p2 }
  0x3a   : > { %p1700_p8 = pnand %p1699_p4, %p1693_p3 }
  0x3c   : > { %1703 = shalt.err (!%p1700_p8)
}
  0x3d   : > { %1576 = dma.hbm_to_vmem [thread:$0]  (!%p1914_p11), %s1912_s23, 128, %s166_s25, %s154_s27  }
  0x3e   : > { %p2563_p7 = scmp.ne.s32.totalorder %s2557_s20, 0 }
  0x3f   : > { %p2564_p10 = scmp.eq.s32.totalorder (!%p2563_p7), %s1838_s16, 0 }
  0x40   : > { %174 = sbr.rel (%p2563_p7) target bundleno = 572 (0x23c), region = 32 }
  0x45   : > { %1747 = dma.done.wait (%p2564_p10), [#allocation6], 16   ;;  %p2565_p6 = pmov %p2564_p10 }
  0x47   : > { %1749 = vsyncadd (%p2565_p6), [#allocation6], 4294967280  ;;  %p2566_p12 = pmov %p2565_p6 }
  0x48   : > { %p2567_p9 = pmov %p2565_p6 }
  0x49   : > { %1751 = dma.done.wait (%p2566_p12), [#allocation4], 32  }
  0x4a   : > { %1753 = vsyncadd (%p2567_p9), [#allocation4], 4294967264  ;;  %s1943_s21 = sand.u32 1, %s1768_s13   ;;  %p2568_p4 = scmp.ne.s32.totalorder %s2555_s18, 0 }
  0x4b   : > { %s2542_s20 = sshll.u32 %s1943_s21, 3  ;;  %s185_s23 = scalar_lea.sflag [#allocation9], %s1943_s21 }
  0x4c   : > { %s1949_s22 = scalar_lea.vmem [#allocation8], %s2542_s20 }
  0x4d   : > { %1755 = dma.done.wait (%p2568_p4), %s185_s23, 128  }
  0x4e   : > { %1757 = vsyncadd (%p2568_p4), %s185_s23, 4294967168 }
  0x4f   : > { %193 = sfence }
  0x50   : > { %v212_v0 = vld [vmem:[%s1949_s22] sm:$0xff]  ;;  %vm216_vm0 = vcmask 1043456   ;;  %vm247_vm1 = vcmask 410624   ;;  %v1781_v8 = vmov 0.0   ;;  %vm249_vm2 = vcmask 828824   ;;  %s1783_s18 = smov 51  }
  0x51   : > { %v1956_v1 = vcombine.high %v212_v0, %v212_v0  ;;  %v217_v2 = vsel %vm216_vm0, %v212_v0, -inf  ;;  %v231_v3 = vsel %vm216_vm0, %v212_v0, 0.0  ;;  %248 = vst.msk [vmem:[#allocation2] sm:$0x3] %vm247_vm1, %v1781_v8  ;;  %v1782_v13 = vmov 1966171168  }
  0x52   : > { %v218_v4 = vrot.slane %v217_v2, 4  ;;  %v232_v5 = vrot.slane %v231_v3, 4  ;;  %250 = vst.msk [vmem:[#allocation2 + $0x4] sm:$0x3] %vm249_vm2, %v1781_v8  ;;  %v255_v14 = vunpack.c.l.s4 %v1782_v13  ;;  %v257_v15 = vlaneseq  ;;  %s1981_s25 = sld [smem:[#allocation3 + $0x9]]  ;;  %s2577_s0 = smov 48  }
  0x53   : > { %v224_v6 = vsel %vm216_vm0, %v1956_v1, -inf  ;;  %v238_v7 = vsel %vm216_vm0, %v1956_v1, 0.0  ;;  %vm271_vm5 = vcmask 416768   ;;  %s1446_s26 = sld [smem:[#allocation3 + $0x3a]]  ;;  %vm331_vm7 = vcmask 916480   ;;  %p2580_p3 = scmp.ne.s32.totalorder %s2561_s9, 0 }
  0x54   : > { %v219_v9 = vmax.f32 %v217_v2, %v218_v4  ;;  %v225_v10 = vrot.slane %v224_v6, 4  ;;  %v233_v11 = vadd.f32 %v232_v5, %v231_v3  ;;  %v239_v12 = vrot.slane %v238_v7, 4  ;;  %s1983_s27 = sld [smem:[#allocation3 + $0x8]] }
  0x55   : > { %v256_v24 = vunpack.c.0.s8 %v255_v14  ;;  %v1960_v25 = vshrl.u32 %v257_v15, 7  ;;  %vm1969_vm3 = vcmp.ge.s32.totalorder %v257_v15, 51  ;;  %vm1973_vm4 = vcmp.lt.s32.totalorder %v257_v15, 307  ;;  %s1425_s28 = sld [smem:[#allocation3 + $0x39]] }
  0x56   : > { %v220_v16 = vrot.slane %v219_v9, 2  ;;  %v226_v17 = vmax.f32 %v224_v6, %v225_v10  ;;  %v234_v18 = vrot.slane %v233_v11, 2  ;;  %v240_v19 = vadd.f32 %v239_v12, %v238_v7  ;;  %vm277_vm6 = vmand %vm1969_vm3, %vm1973_vm4  ;;  %s1449_s29 = sld [smem:[#allocation3 + $0x41]] }
  0x57   : > { %v1963_v35 = vsub.s32 %v256_v24, %v1960_v25  ;;  %s1428_s30 = sld [smem:[#allocation3 + $0x40]]  ;;  %vm350_vm8 = vcmask 785408   ;;  %vm369_vm9 = vcmask 654336   ;;  %vm388_vm10 = vcmask 523264  }
  0x58   : > { %v221_v20 = vmax.f32 %v219_v9, %v220_v16  ;;  %v227_v21 = vrot.slane %v226_v17, 2  ;;  %v235_v22 = vadd.f32 %v234_v18, %v233_v11  ;;  %v241_v23 = vrot.slane %v240_v19, 2  ;;  %s1985_s4 = sld [smem:[#allocation3 + $0x10]] }
  0x59   : > { %s1987_s5 = sld [smem:[#allocation3 + $0x4e]]  ;;  %v594_v53 = vstv %s1446_s26  ;;  %v591_v58 = vstv %s1981_s25  ;;  %vm407_vm11 = vcmask 392192   ;;  %vm426_vm12 = vcmask 261120  }
  0x5a   : > { %v222_v26 = vrot.slane %v221_v20, 1  ;;  %v228_v27 = vmax.f32 %v226_v17, %v227_v21  ;;  %v236_v28 = vrot.slane %v235_v22, 1  ;;  %v242_v29 = vadd.f32 %v241_v23, %v240_v19  ;;  %s1989_s6 = sld [smem:[#allocation3 + $0x47]] }
  0x5b   : > { %s1991_s10 = sld [smem:[#allocation3 + $0xf]]  ;;  %v457_v54 = vstv %s1425_s28  ;;  %v454_v59 = vstv %s1983_s27  ;;  %vm574_vm13 = vcmask 1039360   ;;  %vm711_vm14 = vcmask 1031168  }
  0x5c   : > { %v223_v30 = vmax.f32 %v221_v20, %v222_v26  ;;  %v229_v31 = vrot.slane %v228_v27, 1  ;;  %v237_v32 = vadd.f32 %v236_v28, %v235_v22  ;;  %v243_v33 = vrot.slane %v242_v29, 1  ;;  %s1993_s8 = sld [smem:[#allocation3 + $0x3c]] }
  0x5d   : > { %s1995_s11 = sld [smem:[#allocation3 + $0x1d]]  ;;  %v612_v55 = vstv %s1449_s29  ;;  %v475_v56 = vstv %s1428_s30  ;;  %vm846_vm2 = vcmask 1022976   ;;  %vm982_vm3 = vcmask 1014784  }
  0x5e   : > { %v230_v34 = vmax.f32 %v228_v27, %v229_v31  ;;  %v244_v36 = vadd.f32 %v243_v33, %v242_v29  ;;  %v245_v37 = vmul.f32 0.25, %v237_v32  ;;  %s1997_s17 = sld [smem:[#allocation3 + $0x3b]]  ;;  %v609_v63 = vstv %s1985_s4  ;;  %s2543_s4 = smov 112  }
  0x5f   : > { %s1999_s23 = sld [smem:[#allocation3 + $0x16]]  ;;  %v511_v62 = vstv %s1987_s5 }
  0x60   : > { %v253_v38 = vcombine.low %v223_v30, %v230_v34  ;;  %v246_v39 = vmul.f32 0.25, %v244_v36  ;;  %s2010_s26 = sld [smem:[#allocation3 + $0x55]]  ;;  %v493_v3 = vstv %s1989_s6 }
  0x61   : > { %s2016_s28 = sld [smem:[#allocation3 + $0x48]]  ;;  %v472_v9 = vstv %s1991_s10 }
  0x62   : > { %v260_v40 = vrot.slane %v253_v38, %v1963_v35  ;;  %v281_v41 = vcombine.low %v245_v37, %v246_v39  ;;  %s2020_s25 = sld [smem:[#allocation3 + $0xa]]  ;;  %v865_v11 = vstv %s1993_s8 }
  0x63   : > { %s2025_s27 = sld [smem:[#allocation3 + $0x43]]  ;;  %v508_v19 = vstv %s1995_s11  ;;  %s2553_s11 = smov 96  }
  0x64   : > { %v267_v42 = vrot.slane %v260_v40, %v1963_v35  ;;  %v288_v43 = vrot.slane %v281_v41, %v1963_v35  ;;  %s2028_s29 = sld [smem:[#allocation3 + $0x24]]  ;;  %v731_v16 = vstv %s1997_s17 }
  0x65   : > { %s2031_s30 = sld [smem:[#allocation3 + $0x42]]  ;;  %v490_v21 = vstv %s1999_s23 }
  0x66   : > { %268 = vrot.lane.b32.xlu0 %v267_v42, %s1783_s18  ;;  %v295_v44 = vrot.slane %v288_v43, %v1963_v35  ;;  %s2038_s5 = sld [smem:[#allocation3 + $0x17]]  ;;  %v529_v29 = vstv %s2010_s26 }
  0x67   : > { %s2042_s6 = sld [smem:[#allocation3 + $0x49]]  ;;  %v630_v30 = vstv %s2016_s28  ;;  %s2547_s28 = smov 64  }
  0x68   : > { %s2045_s10 = sld [smem:[#allocation3 + $0x12]]  ;;  %v728_v36 = vstv %s2020_s25  ;;  %s2545_s25 = smov 80  }
  0x69   : > { %s2050_s8 = sld [smem:[#allocation3 + $0x4f]]  ;;  %v883_v37 = vstv %s2025_s27 }
  0x6a   : > { %296 = vrot.lane.b32.xlu0 %v295_v44, %s1783_s18  ;;  %s2005_s18 = sld [smem:[#allocation3 + $0xb]]  ;;  %v526_v45 = vstv %s2028_s29 }
  0x6b   : > { %s2056_s17 = sld [smem:[#allocation3 + $0x11]]  ;;  %v749_v43 = vstv %s2031_s30 }
  0x6c   : > { %s2060_s23 = sld [smem:[#allocation3 + $0x18]] }
  0x6d   : > { %s2064_s26 = sld [smem:[#allocation3 + $0x56]] }
  0x6e   : > { %s2074_s27 = sld [smem:[#allocation3 + $0x1e]] }
  0x6f   : > { %s2079_s30 = sld [smem:[#allocation3 + $0x44]] }
  0x70   : > { %v862_v32 = vstv %s2005_s18  ;;  %s2068_s18 = sld [smem:[#allocation3 + $0x3d]] }
  0x71   : > { %s2082_s20 = sld [smem:[#allocation3 + $0x25]] }
  0x72   : > { %s2085_s29 = sld [smem:[#allocation3 + $0x5c]] }
  0xd8   : > { %v269_v47 = vpop.permute.xlu0 %268 }
  0xd9   : > { %v270_v48 = vrot.slane %v269_v47, 7 }
  0xdb   : > { %v272_v49 = vsel %vm271_vm5, %v270_v48, %v269_v47  ;;  %v627_v47 = vstv %s2038_s5  ;;  %s2092_s5 = sld [smem:[#allocation3 + $0xc]] }
  0xdc   : > { %278 = vst.msk [vmem:[#allocation2] ss:$2 sm:$0x7] %vm277_vm6, %v272_v49  ;;  %v297_v50 = vpop.permute.xlu0 %296  ;;  %v767_v49 = vstv %s2042_s6  ;;  %s2096_s6 = sld [smem:[#allocation3 + $0x50]] }
  0xdd   : > { %v298_v51 = vrot.slane %v297_v50, 7 }
  0xdf   : > { %v299_v52 = vsel %vm271_vm5, %v298_v51, %v297_v50 }
  0xe0   : > { %302 = vst.msk [vmem:[#allocation2 + $0x1] ss:$2 sm:$0x7] %vm277_vm6, %v299_v52  ;;  %vm1119_vm6 = vcmask 1006592  }
  0xe7   : > { %v2001_v57 = vld [vmem:[#allocation2] sm:$0x3f] }
  0xe8   : > { %v595_v60 = vmul.f32 %v594_v53, %v2001_v57  ;;  %v458_v61 = vmul.f32 %v457_v54, %v2001_v57  ;;  %v613_v0 = vmul.f32 %v612_v55, %v2001_v57  ;;  %v476_v2 = vmul.f32 %v475_v56, %v2001_v57 }
  0xe9   : > { %v592_v4 = vmul.f32 %v591_v58, %v2001_v57  ;;  %v455_v6 = vmul.f32 %v454_v59, %v2001_v57  ;;  %v512_v10 = vmul.f32 %v511_v62, %v2001_v57  ;;  %v494_v15 = vmul.f32 %v493_v3, %v2001_v57 }
  0xea   : > { %v1447_v5 = vrot.slane %v595_v60, 9  ;;  %v1426_v7 = vrot.slane %v458_v61, 9  ;;  %v1450_v8 = vrot.slane %v613_v0, 9  ;;  %v1429_v14 = vrot.slane %v476_v2, 9 }
  0xeb   : > { %v610_v17 = vmul.f32 %v609_v63, %v2001_v57  ;;  %v473_v18 = vmul.f32 %v472_v9, %v2001_v57  ;;  %v1435_v20 = vrot.slane %v512_v10, 9  ;;  %v866_v22 = vmul.f32 %v865_v11, %v2001_v57 }
  0xec   : > { %v600_v12 = vadd.f32 %v1447_v5, %v592_v4  ;;  %v463_v13 = vadd.f32 %v1426_v7, %v455_v6  ;;  %v1432_v26 = vrot.slane %v494_v15, 9  ;;  %v732_v27 = vmul.f32 %v731_v16, %v2001_v57 }
  0xed   : > { %v618_v23 = vadd.f32 %v1450_v8, %v610_v17  ;;  %v481_v24 = vadd.f32 %v1429_v14, %v473_v18  ;;  %v509_v28 = vmul.f32 %v508_v19, %v2001_v57  ;;  %v491_v31 = vmul.f32 %v490_v21, %v2001_v57 }
  0xee   : > { %602 = vrot.lane.b32.xlu0 %v600_v12, %s2543_s4  ;;  %465 = vrot.lane.b32.xlu1 %v463_v13, %s2543_s4  ;;  %v1489_v34 = vrot.slane %v866_v22, 9  ;;  %v1468_v39 = vrot.slane %v732_v27, 9  ;;  %v530_v40 = vmul.f32 %v529_v29, %v2001_v57  ;;  %v631_v41 = vmul.f32 %v630_v30, %v2001_v57 }
  0xef   : > { %v517_v33 = vadd.f32 %v1435_v20, %v509_v28  ;;  %v499_v38 = vadd.f32 %v1432_v26, %v491_v31  ;;  %v863_v42 = vmul.f32 %v862_v32, %v2001_v57  ;;  %v729_v44 = vmul.f32 %v728_v36, %v2001_v57 }
  0xf0   : > { %v884_v48 = vmul.f32 %v883_v37, %v2001_v57  ;;  %v1438_v51 = vrot.slane %v530_v40, 9  ;;  %v1453_v52 = vrot.slane %v631_v41, 9  ;;  %v750_v53 = vmul.f32 %v749_v43, %v2001_v57 }
  0xf1   : > { %v871_v46 = vadd.f32 %v1489_v34, %v863_v42  ;;  %v737_v50 = vadd.f32 %v1468_v39, %v729_v44  ;;  %v648_v54 = vstv %s2050_s8  ;;  %v527_v55 = vmul.f32 %v526_v45, %v2001_v57  ;;  %s2099_s8 = sld [smem:[#allocation3 + $0x13]] }
  0xf2   : > { %620 = vrot.lane.b32.xlu0 %v618_v23, %s2553_s11  ;;  %483 = vrot.lane.b32.xlu1 %v481_v24, %s2553_s11  ;;  %v628_v56 = vmul.f32 %v627_v47, %v2001_v57  ;;  %v880_v58 = vstv %s2045_s10  ;;  %v1492_v59 = vrot.slane %v884_v48, 9  ;;  %v746_v60 = vstv %s2056_s17  ;;  %s2104_s10 = sld [smem:[#allocation3 + $0x4a]]  ;;  %s2549_s17 = smov 48  }
  0xf3   : > { %v768_v61 = vmul.f32 %v767_v49, %v2001_v57  ;;  %v535_v62 = vadd.f32 %v1438_v51, %v527_v55  ;;  %v1471_v0 = vrot.slane %v750_v53, 9  ;;  %v649_v2 = vmul.f32 %v648_v54, %v2001_v57 }
  0xf4   : > { %v636_v63 = vadd.f32 %v1453_v52, %v628_v56  ;;  %v881_v3 = vmul.f32 %v880_v58, %v2001_v57  ;;  %v666_v4 = vstv %s2064_s26  ;;  %v1002_v5 = vstv %s2068_s18  ;;  %s2114_s26 = sld [smem:[#allocation3 + $0x1f]] }
  0xf5   : > { %v747_v6 = vmul.f32 %v746_v60, %v2001_v57  ;;  %v764_v7 = vstv %s2060_s23  ;;  %v1474_v9 = vrot.slane %v768_v61, 9  ;;  %v645_v10 = vstv %s2074_s27  ;;  %s2118_s18 = sld [smem:[#allocation3 + $0x51]] }
  0xf6   : > { %519 = vrot.lane.b32.xlu0 %v517_v33, %s2547_s28  ;;  %501 = vrot.lane.b32.xlu1 %v499_v38, %s2545_s25  ;;  %v889_v8 = vadd.f32 %v1492_v59, %v881_v3  ;;  %v1020_v11 = vstv %s2079_s30  ;;  %v1456_v13 = vrot.slane %v649_v2, 9  ;;  %v667_v14 = vmul.f32 %v666_v4, %v2001_v57  ;;  %s2122_s23 = sld [smem:[#allocation3 + $0x3e]] }
  0xf7   : > { %v755_v12 = vadd.f32 %v1471_v0, %v747_v6  ;;  %v1003_v15 = vmul.f32 %v1002_v5, %v2001_v57  ;;  %v765_v16 = vmul.f32 %v764_v7, %v2001_v57  ;;  %v547_v17 = vstv %s2085_s29  ;;  %s2128_s27 = sld [smem:[#allocation3 + $0x19]] }
  0xf8   : > { %v646_v18 = vmul.f32 %v645_v10, %v2001_v57  ;;  %v663_v19 = vstv %s2082_s20  ;;  %v999_v21 = vstv %s2092_s5  ;;  %v1021_v22 = vmul.f32 %v1020_v11, %v2001_v57  ;;  %s2133_s30 = sld [smem:[#allocation3 + $0x45]] }
  0xf9   : > { %v773_v20 = vadd.f32 %v1474_v9, %v765_v16  ;;  %v785_v23 = vstv %s2096_s6  ;;  %v1459_v26 = vrot.slane %v667_v14, 9  ;;  %v1510_v27 = vrot.slane %v1003_v15, 9  ;;  %s2136_s29 = sld [smem:[#allocation3 + $0x20]] }
  0xfa   : > { %873 = vrot.lane.b32.xlu0 %v871_v46, %s2543_s4  ;;  %739 = vrot.lane.b32.xlu1 %v737_v50, %s2543_s4  ;;  %s2110_s4 = sld [smem:[#allocation3 + $0x2b]]  ;;  %v654_v24 = vadd.f32 %v1456_v13, %v646_v18  ;;  %v548_v28 = vmul.f32 %v547_v17, %v2001_v57  ;;  %v901_v29 = vstv %s2104_s10  ;;  %v664_v30 = vmul.f32 %v663_v19, %v2001_v57 }
  0xfb   : > { %s2139_s20 = sld [smem:[#allocation3 + $0x5d]]  ;;  %v1000_v31 = vmul.f32 %v999_v21, %v2001_v57  ;;  %v1017_v32 = vstv %s2099_s8  ;;  %v1513_v33 = vrot.slane %v1021_v22, 9  ;;  %v786_v36 = vmul.f32 %v785_v23, %v2001_v57 }
  0xfc   : > { %s2146_s5 = sld [smem:[#allocation3 + $0xd]]  ;;  %v672_v37 = vadd.f32 %v1459_v26, %v664_v30  ;;  %v1441_v39 = vrot.slane %v548_v28, 9  ;;  %v902_v40 = vmul.f32 %v901_v29, %v2001_v57  ;;  %v1018_v41 = vmul.f32 %v1017_v32, %v2001_v57 }
  0xfd   : > { %s2150_s6 = sld [smem:[#allocation3 + $0x58]]  ;;  %v1008_v38 = vadd.f32 %v1510_v27, %v1000_v31  ;;  %v919_v42 = vstv %s2118_s18  ;;  %v1139_v43 = vstv %s2122_s23  ;;  %v782_v45 = vstv %s2114_s26  ;;  %s2551_s23 = smov 32  }
  0xfe   : > { %537 = vrot.lane.b32.xlu0 %v535_v62, %s2549_s17  ;;  %638 = vrot.lane.b32.xlu1 %v636_v63, %s2545_s25  ;;  %s2153_s10 = sld [smem:[#allocation3 + $0x14]]  ;;  %v1026_v46 = vadd.f32 %v1513_v33, %v1018_v41  ;;  %v1477_v47 = vrot.slane %v786_v36, 9  ;;  %v898_v48 = vstv %s2128_s27  ;;  %v1157_v49 = vstv %s2133_s30 }
  0xff   : > { %s2158_s8 = sld [smem:[#allocation3 + $0x4b]]  ;;  %v1495_v51 = vrot.slane %v902_v40, 9  ;;  %v920_v52 = vmul.f32 %v919_v42, %v2001_v57  ;;  %v1140_v53 = vmul.f32 %v1139_v43, %v2001_v57  ;;  %v783_v54 = vmul.f32 %v782_v45, %v2001_v57 }
 0x100   : > { %v544_v34 = vstv %s2110_s4  ;;  %s2573_s4 = smov 112   ;;  %s2172_s18 = sld [smem:[#allocation3 + $0x4c]]  ;;  %v899_v56 = vmul.f32 %v898_v48, %v2001_v57  ;;  %v916_v58 = vstv %s2136_s29  ;;  %v1158_v61 = vmul.f32 %v1157_v49, %v2001_v57 }
 0x101   : > { %v545_v44 = vmul.f32 %v544_v34, %v2001_v57  ;;  %v684_v55 = vstv %s2139_s20  ;;  %s2176_s26 = sld [smem:[#allocation3 + $0x57]]  ;;  %v791_v59 = vadd.f32 %v1477_v47, %v783_v54  ;;  %v1498_v0 = vrot.slane %v920_v52, 9 }
 0x102   : > { %891 = vrot.lane.b32.xlu0 %v889_v8, %s2553_s11  ;;  %757 = vrot.lane.b32.xlu1 %v755_v12, %s2553_s11  ;;  %s2182_s27 = sld [smem:[#allocation3 + $0x1a]]  ;;  %v1136_v60 = vstv %s2146_s5  ;;  %v907_v63 = vadd.f32 %v1495_v51, %v899_v56  ;;  %v1531_v2 = vrot.slane %v1140_v53, 9  ;;  %v685_v3 = vmul.f32 %v684_v55, %v2001_v57 }
 0x103   : > { %v553_v50 = vadd.f32 %v1441_v39, %v545_v44  ;;  %v937_v62 = vstv %s2150_s6  ;;  %s2187_s30 = sld [smem:[#allocation3 + $0x5f]]  ;;  %v917_v5 = vmul.f32 %v916_v58, %v2001_v57  ;;  %v1137_v6 = vmul.f32 %v1136_v60, %v2001_v57 }
 0x104   : > { %s2190_s20 = sld [smem:[#allocation3 + $0x1b]]  ;;  %v1154_v7 = vstv %s2153_s10  ;;  %v1534_v8 = vrot.slane %v1158_v61, 9  ;;  %v938_v10 = vmul.f32 %v937_v62, %v2001_v57  ;;  %v1462_v13 = vrot.slane %v685_v3, 9 }
 0x105   : > { %v1038_v4 = vstv %s2158_s8  ;;  %s2193_s29 = sld [smem:[#allocation3 + $0x52]]  ;;  %v925_v11 = vadd.f32 %v1498_v0, %v917_v5  ;;  %v1145_v12 = vadd.f32 %v1531_v2, %v1137_v6  ;;  %v1155_v15 = vmul.f32 %v1154_v7, %v2001_v57 }
 0x106   : > { %775 = vrot.lane.b32.xlu0 %v773_v20, %s2545_s25  ;;  %656 = vrot.lane.b32.xlu1 %v654_v24, %s2547_s28  ;;  %s2164_s25 = sld [smem:[#allocation3 + $0x2c]]  ;;  %v1039_v14 = vmul.f32 %v1038_v4, %v2001_v57  ;;  %v1175_v16 = vstv %s2172_s18  ;;  %v1501_v21 = vrot.slane %v938_v10, 9 }
 0x107   : > { %s2168_s28 = sld [smem:[#allocation3 + $0x27]]  ;;  %v803_v17 = vstv %s2176_s26  ;;  %v1163_v20 = vadd.f32 %v1534_v8, %v1155_v15  ;;  %v1176_v27 = vmul.f32 %v1175_v16, %v2001_v57 }
 0x108   : > { %s2200_s5 = sld [smem:[#allocation3 + $0x26]]  ;;  %v1035_v22 = vstv %s2182_s27  ;;  %v1516_v26 = vrot.slane %v1039_v14, 9  ;;  %v804_v28 = vmul.f32 %v803_v17, %v2001_v57  ;;  %s2576_s27 = smov 32  }
 0x109   : > { %s2204_s6 = sld [smem:[#allocation3 + $0x53]]  ;;  %v955_v23 = vstv %s2187_s30  ;;  %v1036_v31 = vmul.f32 %v1035_v22, %v2001_v57  ;;  %v1537_v39 = vrot.slane %v1176_v27, 9 }
 0x10a   : > { %674 = vrot.lane.b32.xlu0 %v672_v37, %s2549_s17  ;;  %1010 = vrot.lane.b32.xlu1 %v1008_v38, %s2573_s4  ;;  %s2574_s17 = smov 64   ;;  %s2207_s8 = sld [smem:[#allocation3 + $0x2e]]  ;;  %v1172_v32 = vstv %s2190_s20  ;;  %v956_v36 = vmul.f32 %v955_v23, %v2001_v57  ;;  %v1480_v40 = vrot.slane %v804_v28, 9 }
 0x10b   : > { %s2212_s10 = sld [smem:[#allocation3 + $0x5e]]  ;;  %v1056_v30 = vstv %s2193_s29  ;;  %v1044_v38 = vadd.f32 %v1516_v26, %v1036_v31  ;;  %v1173_v43 = vmul.f32 %v1172_v32, %v2001_v57 }
 0x10c   : > { %v681_v9 = vstv %s2164_s25  ;;  %s2218_s25 = sld [smem:[#allocation3 + $0x21]]  ;;  %v1057_v41 = vmul.f32 %v1056_v30, %v2001_v57 }
 0x10d   : > { %v682_v18 = vmul.f32 %v681_v9, %v2001_v57  ;;  %v934_v19 = vstv %s2168_s28  ;;  %s2222_s18 = sld [smem:[#allocation3 + $0x22]]  ;;  %v1181_v49 = vadd.f32 %v1537_v39, %v1173_v43 }
 0x10e   : > { %1028 = vrot.lane.b32.xlu0 %v1026_v46, %s2553_s11  ;;  %555 = vrot.lane.b32.xlu1 %v553_v50, %s2551_s23  ;;  %s2575_s23 = smov 80   ;;  %s2226_s26 = sld [smem:[#allocation3 + $0x5a]]  ;;  %v935_v29 = vmul.f32 %v934_v19, %v2001_v57  ;;  %v800_v34 = vstv %s2200_s5  ;;  %v1504_v46 = vrot.slane %v956_v36, 9  ;;  %v1519_v51 = vrot.slane %v1057_v41, 9 }
 0x10f   : > { %v690_v24 = vadd.f32 %v1462_v13, %v682_v18  ;;  %s2230_s28 = sld [smem:[#allocation3 + $0x59]]  ;;  %v1193_v37 = vstv %s2204_s6  ;;  %v801_v44 = vmul.f32 %v800_v34, %v2001_v57 }
 0x110   : > { %s2236_s30 = sld [smem:[#allocation3 + $0x2d]]  ;;  %v943_v33 = vadd.f32 %v1501_v21, %v935_v29  ;;  %v952_v45 = vstv %s2207_s8  ;;  %v1194_v48 = vmul.f32 %v1193_v37, %v2001_v57 }
 0x111   : > { %s2241_s29 = sld [smem:[#allocation3 + $0x60]]  ;;  %v821_v42 = vstv %s2212_s10  ;;  %v809_v50 = vadd.f32 %v1480_v40, %v801_v44  ;;  %v953_v53 = vmul.f32 %v952_v45, %v2001_v57 }
 0x112   : > { %793 = vrot.lane.b32.xlu0 %v791_v59, %s2574_s17  ;;  %909 = vrot.lane.b32.xlu1 %v907_v63, %s2575_s23  ;;  %s2247_s20 = sld [smem:[#allocation3 + $0x38]]  ;;  %v1053_v47 = vstv %s2218_s25  ;;  %v822_v52 = vmul.f32 %v821_v42, %v2001_v57  ;;  %v1540_v60 = vrot.slane %v1194_v48, 9 }
 0x113   : > { %s2254_s5 = sld [smem:[#allocation3 + $0x28]]  ;;  %v1054_v56 = vmul.f32 %v1053_v47, %v2001_v57  ;;  %v1190_v58 = vstv %s2222_s18  ;;  %v961_v59 = vadd.f32 %v1504_v46, %v953_v53 }
 0x114   : > { %s2258_s6 = sld [smem:[#allocation3 + $0x61]]  ;;  %v1211_v54 = vstv %s2226_s26  ;;  %v1483_v0 = vrot.slane %v822_v52, 9  ;;  %v1191_v4 = vmul.f32 %v1190_v58, %v2001_v57 }
 0x115   : > { %v1074_v55 = vstv %s2230_s28  ;;  %s2264_s8 = sld [smem:[#allocation3 + $0x46]]  ;;  %v1062_v63 = vadd.f32 %v1519_v51, %v1054_v56  ;;  %v1212_v2 = vmul.f32 %v1211_v54, %v2001_v57 }
 0x116   : > { %927 = vrot.lane.b32.xlu0 %v925_v11, %s2574_s17  ;;  %1147 = vrot.lane.b32.xlu1 %v1145_v12, %s2573_s4  ;;  %s2270_s10 = sld [smem:[#allocation3 + $0x2f]]  ;;  %v818_v61 = vstv %s2236_s30  ;;  %v1075_v3 = vmul.f32 %v1074_v55, %v2001_v57  ;;  %v1199_v8 = vadd.f32 %v1540_v60, %v1191_v4 }
 0x117   : > { %v1092_v62 = vstv %s2241_s29  ;;  %s2274_s25 = sld [smem:[#allocation3 + $0x7]]  ;;  %v819_v6 = vmul.f32 %v818_v61, %v2001_v57  ;;  %v1543_v13 = vrot.slane %v1212_v2, 9 }
 0x118   : > { %s2278_s26 = sld [smem:[#allocation3 + $0x3f]]  ;;  %v320_v5 = vstv %s2247_s20  ;;  %v1093_v10 = vmul.f32 %v1092_v62, %v2001_v57  ;;  %v1522_v14 = vrot.slane %v1075_v3, 9 }
 0x119   : > { %s2282_s18 = sld [smem:[#allocation3 + $0x54]]  ;;  %v1071_v9 = vstv %s2254_s5  ;;  %v827_v12 = vadd.f32 %v1483_v0, %v819_v6  ;;  %v321_v15 = vmul.f32 %v320_v5, %v2001_v57 }
 0x11a   : > { %1165 = vrot.lane.b32.xlu0 %v1163_v20, %s2553_s11  ;;  %692 = vrot.lane.b32.xlu1 %v690_v24, %s2576_s27  ;;  %s2244_s11 = sld [smem:[#allocation3 + $0x29]]  ;;  %v1229_v11 = vstv %s2258_s6  ;;  %v1072_v18 = vmul.f32 %v1071_v9, %v2001_v57  ;;  %v1525_v20 = vrot.slane %v1093_v10, 9 }
 0x11b   : > { %s2288_s28 = sld [smem:[#allocation3 + $0x30]]  ;;  %v358_v16 = vstv %s2264_s8  ;;  %v1230_v22 = vmul.f32 %v1229_v11, %v2001_v57  ;;  %v1405_v26 = vrot.slane %v321_v15, 9 }
 0x11c   : > { %s2293_s30 = sld [smem:[#allocation3 + $0x15]]  ;;  %v1089_v19 = vstv %s2270_s10  ;;  %v1080_v24 = vadd.f32 %v1522_v14, %v1072_v18  ;;  %v359_v27 = vmul.f32 %v358_v16, %v2001_v57 }
 0x11d   : > { %s2297_s29 = sld [smem:[#allocation3 + $0x4d]]  ;;  %v317_v21 = vstv %s2274_s25  ;;  %v1090_v28 = vmul.f32 %v1089_v19, %v2001_v57  ;;  %v1546_v34 = vrot.slane %v1230_v22, 9 }
 0x11e   : > { %945 = vrot.lane.b32.xlu0 %v943_v33, %s2577_s0  ;;  %1046 = vrot.lane.b32.xlu1 %v1044_v38, %s2575_s23  ;;  %s2308_s20 = sld [smem:[#allocation3 + $0x23]]  ;;  %v339_v29 = vstv %s2278_s26  ;;  %v318_v31 = vmul.f32 %v317_v21, %v2001_v57  ;;  %v1411_v38 = vrot.slane %v359_v27, 9 }
 0x11f   : > { %v396_v30 = vstv %s2282_s18  ;;  %s2314_s5 = sld [smem:[#allocation3 + $0x5b]]  ;;  %v1098_v33 = vadd.f32 %v1525_v20, %v1090_v28  ;;  %v340_v39 = vmul.f32 %v339_v29, %v2001_v57 }
 0x120   : > { %v1208_v7 = vstv %s2244_s11  ;;  %s2304_s11 = sld [smem:[#allocation3 + $0xe]]  ;;  %v326_v37 = vadd.f32 %v1405_v26, %v318_v31  ;;  %v397_v40 = vmul.f32 %v396_v30, %v2001_v57 }
 0x121   : > { %v1209_v17 = vmul.f32 %v1208_v7, %v2001_v57  ;;  %v1226_v32 = vstv %s2288_s28  ;;  %s2321_s6 = sld [smem:[#allocation3 + $0x1c]]  ;;  %v1408_v48 = vrot.slane %v340_v39, 9  ;;  %s1790_s28 = smov 127  }
 0x122   : > { %1183 = vrot.lane.b32.xlu0 %v1181_v49, %s2575_s23  ;;  %811 = vrot.lane.b32.xlu1 %v809_v50, %s2577_s0  ;;  %v355_v36 = vstv %s2293_s30  ;;  %v1227_v41 = vmul.f32 %v1226_v32, %v2001_v57  ;;  %s1418_s8 = sld [smem:[#allocation3 + $0x2a]]  ;;  %v1417_v49 = vrot.slane %v397_v40, 9 }
 0x123   : > { %v1217_v23 = vadd.f32 %v1543_v13, %v1209_v17  ;;  %v377_v42 = vstv %s2297_s29  ;;  %v356_v43 = vmul.f32 %v355_v36, %v2001_v57  ;;  %s2366_s10 = sld [smem:[#allocation3 + $0x35]] }
 0x124   : > { %v1235_v44 = vadd.f32 %v1546_v34, %v1227_v41  ;;  %v393_v46 = vstv %s2308_s20  ;;  %v378_v50 = vmul.f32 %v377_v42, %v2001_v57  ;;  %s2373_s25 = sld [smem:[#allocation3 + $0x34]] }
 0x125   : > { %v364_v47 = vadd.f32 %v1411_v38, %v356_v43  ;;  %v415_v51 = vstv %s2314_s5  ;;  %v394_v53 = vmul.f32 %v393_v46, %v2001_v57  ;;  %s2377_s26 = sld [smem:[#allocation3 + $0x4]]  ;;  %s1791_s5 = smov 126  }
 0x126   : > { %963 = vrot.lane.b32.xlu0 %v961_v59, %s2576_s27  ;;  %1064 = vrot.lane.b32.xlu1 %v1062_v63, %s2574_s17  ;;  %v336_v45 = vstv %s2304_s11  ;;  %v1414_v58 = vrot.slane %v378_v50, 9  ;;  %v416_v59 = vmul.f32 %v415_v51, %v2001_v57  ;;  %s2385_s18 = sld [smem:[#allocation3 + $0x3]] }
 0x127   : > { %v337_v52 = vmul.f32 %v336_v45, %v2001_v57  ;;  %v374_v54 = vstv %s2321_s6  ;;  %v402_v56 = vadd.f32 %v1417_v49, %v394_v53  ;;  %s2394_s30 = sld [smem:[#allocation3 + $0x36]] }
 0x128   : > { %v375_v60 = vmul.f32 %v374_v54, %v2001_v57  ;;  %v412_v61 = vstv %s1418_s8  ;;  %v1420_v63 = vrot.slane %v416_v59, 9  ;;  %s2403_s29 = sld [smem:[#allocation3 + $0x37]] }
 0x129   : > { %v345_v55 = vadd.f32 %v1408_v48, %v337_v52  ;;  %v413_v0 = vmul.f32 %v412_v61, %v2001_v57  ;;  %v854_v61 = vstv %s2366_s10  ;;  %s2410_s11 = sld [smem:[#allocation3 + $0x5]]  ;;  %s2579_s10 = sshll.u32 %s1943_s21, 3 }
 0x12a   : > { %1201 = vrot.lane.b32.xlu0 %v1199_v8, %s2574_s17  ;;  %829 = vrot.lane.b32.xlu1 %v827_v12, %s2576_s27  ;;  %v383_v62 = vadd.f32 %v1414_v58, %v375_v60  ;;  %s2419_s20 = sld [smem:[#allocation3 + $0x6]] }
 0x12b   : > { %v421_v2 = vadd.f32 %v1420_v63, %v413_v0  ;;  %s2441_s6 = sld [smem:[#allocation3 + $0x31]] }
 0x12c   : > { %s2467_s8 = sld [smem:[#allocation3]] }
 0x12e   : > { %1219 = vrot.lane.b32.xlu0 %v1217_v23, %s2577_s0  ;;  %1082 = vrot.lane.b32.xlu1 %v1080_v24, %s2577_s0 }
 0x132   : > { %1100 = vrot.lane.b32.xlu1 %v1098_v33, %s2576_s27  ;;  %328 = vrot.lane.b32.xlu0 %v326_v37, %s2573_s4  ;;  %s2578_s4 = smov 96  }
 0x136   : > { %1237 = vrot.lane.b32.xlu1 %v1235_v44, %s2576_s27  ;;  %366 = vrot.lane.b32.xlu0 %v364_v47, %s2575_s23  ;;  %s1422_s23 = sld [smem:[#allocation3 + $0x32]] }
 0x13a   : > { %347 = vrot.lane.b32.xlu1 %v345_v55, %s2578_s4  ;;  %404 = vrot.lane.b32.xlu0 %v402_v56, %s2577_s0  ;;  %s1421_s0 = sld [smem:[#allocation3 + $0x1]]  ;;  %s1792_s4 = smov 124  }
 0x13c   : > { %v446_v9 = vstv %s1422_s23  ;;  %s1793_s23 = smov 125  }
 0x13d   : > { %v447_v12 = vmul.f32 %v446_v9, %v2001_v57 }
 0x13e   : > { %385 = vrot.lane.b32.xlu1 %v383_v62, %s2574_s17  ;;  %s1443_s17 = sld [smem:[#allocation3 + $0x33]] }
 0x13f   : > { %v1423_v17 = vrot.slane %v447_v12, 9 }
 0x140   : > { %v443_v15 = vstv %s1421_s0  ;;  %s1794_s0 = smov 123  }
 0x141   : > { %v444_v19 = vmul.f32 %v443_v15, %v2001_v57 }
 0x142   : > { %423 = vrot.lane.b32.xlu1 %v421_v2, %s2576_s27  ;;  %s1442_s27 = sld [smem:[#allocation3 + $0x2]] }
 0x143   : > { %v452_v24 = vadd.f32 %v1423_v17, %v444_v19 }
 0x144   : > { %v583_v30 = vstv %s1443_s17  ;;  %s1795_s17 = smov 122  }
 0x145   : > { %v584_v36 = vmul.f32 %v583_v30, %v2001_v57 }
 0x147   : > { %v1444_v44 = vrot.slane %v584_v36, 9 }
 0x148   : > { %v580_v40 = vstv %s1442_s27  ;;  %s1553_s27 = sshll.u32 %s1838_s16, 7  ;;  %s1796_s16 = smov [#allocation10]  }
 0x149   : > { %v581_v50 = vmul.f32 %v580_v40, %v2001_v57 }
 0x14b   : > { %v589_v55 = vadd.f32 %v1444_v44, %v581_v50 }
 0x160   : > { %v603_v3 = vpop.permute.xlu0 %602  ;;  %v466_v4 = vpop.permute.xlu1 %465 }
 0x161   : > { %v467_v16 = vrot.slane %v466_v4, 2  ;;  %v604_v41 = vrot.slane %v603_v3, 2 }
 0x163   : > { %v468_v22 = vsel %vm331_vm7, %v466_v4, %v467_v16  ;;  %v605_v52 = vsel %vm331_vm7, %v603_v3, %v604_v41 }
 0x164   : > { %v2346_v5 = vpop.permute.xlu0 %620  ;;  %v484_v6 = vpop.permute.xlu1 %483  ;;  %v470_v27 = vadd.f32 %v468_v22, %v452_v24  ;;  %v607_v63 = vadd.f32 %v605_v52, %v589_v55 }
 0x165   : > { %v485_v18 = vrot.slane %v484_v6, 2  ;;  %v622_v48 = vrot.slane %v2346_v5, 2 }
 0x167   : > { %v486_v26 = vsel %vm350_vm8, %v484_v6, %v485_v18  ;;  %v623_v60 = vsel %vm350_vm8, %v2346_v5, %v622_v48  ;;  %v855_v6 = vmul.f32 %v854_v61, %v2001_v57  ;;  %v720_v5 = vstv %s2373_s25  ;;  %s211_s25 = scalar_lea.vmem [#allocation10], %s2579_s10 }
 0x168   : > { %v520_v7 = vpop.permute.xlu0 %519  ;;  %v502_v8 = vpop.permute.xlu1 %501  ;;  %v488_v32 = vadd.f32 %v486_v26, %v470_v27  ;;  %v625_v4 = vadd.f32 %v623_v60, %v607_v63  ;;  %v721_v17 = vmul.f32 %v720_v5, %v2001_v57  ;;  %v717_v27 = vstv %s2385_s18 }
 0x169   : > { %v503_v23 = vrot.slane %v502_v8, 2  ;;  %v521_v33 = vrot.slane %v520_v7, 2  ;;  %v1486_v16 = vrot.slane %v855_v6, 9  ;;  %v1128_v61 = vstv %s2403_s29  ;;  %s1280_s29 = scalar_lea.sflag [#allocation5], %s1943_s21 }
 0x16a   : > { %v1465_v36 = vrot.slane %v721_v17, 9  ;;  %v2447_v17 = vld [vmem:[#allocation2] sm:$0x3f] }
 0x16b   : > { %v504_v31 = vsel %vm369_vm9, %v502_v8, %v503_v23  ;;  %v522_v42 = vsel %vm388_vm10, %v520_v7, %v521_v33 }
 0x16c   : > { %v2348_v10 = vpop.permute.xlu0 %873  ;;  %v2350_v11 = vpop.permute.xlu1 %739  ;;  %v506_v37 = vadd.f32 %v504_v31, %v488_v32 }
 0x16d   : > { %v875_v15 = vrot.slane %v2348_v10, 2  ;;  %v741_v31 = vrot.slane %v2350_v11, 2 }
 0x16e   : > { %v524_v45 = vadd.f32 %v522_v42, %v506_v37 }
 0x16f   : > { %v876_v30 = vsel %vm331_vm7, %v2348_v10, %v875_v15  ;;  %v742_v48 = vsel %vm331_vm7, %v2350_v11, %v741_v31 }
 0x170   : > { %v538_v13 = vpop.permute.xlu0 %537  ;;  %v639_v14 = vpop.permute.xlu1 %638 }
 0x171   : > { %v539_v34 = vrot.slane %v538_v13, 2  ;;  %v640_v53 = vrot.slane %v639_v14, 2 }
 0x173   : > { %v540_v43 = vsel %vm407_vm11, %v538_v13, %v539_v34  ;;  %v641_v2 = vsel %vm369_vm9, %v639_v14, %v640_v53  ;;  %v851_v13 = vstv %s2377_s26  ;;  %s1294_s26 = sshll.u32 %s211_s25, 4  ;;  %s1295_s26 = int_to_ptr.vmem [resolvable:$true] %s1294_s26 }
 0x174   : > { %v2354_v20 = vpop.permute.xlu0 %891  ;;  %v2356_v21 = vpop.permute.xlu1 %757  ;;  %v542_v51 = vadd.f32 %v540_v43, %v524_v45  ;;  %v643_v12 = vadd.f32 %v641_v2, %v625_v4  ;;  %v852_v26 = vmul.f32 %v851_v13, %v2001_v57  ;;  %v991_v43 = vstv %s2394_s30  ;;  %s1292_s30 = scalar_lea.hbm %s2537_s3, %s1553_s27 }
 0x175   : > { %v893_v23 = vrot.slane %v2354_v20, 2  ;;  %v759_v42 = vrot.slane %v2356_v21, 2  ;;  %v718_v45 = vmul.f32 %v717_v27, %v2001_v57  ;;  %v992_v53 = vmul.f32 %v991_v43, %v2001_v57 }
 0x176   : > { %v860_v34 = vadd.f32 %v1486_v16, %v852_v26  ;;  %v988_v2 = vstv %s2410_s11  ;;  %s1704_s11 = scalar_lea.vmem %s1295_s26, 128 }
 0x177   : > { %v894_v41 = vsel %vm350_vm8, %v2354_v20, %v893_v23  ;;  %v1507_v5 = vrot.slane %v992_v53, 9  ;;  %p1705_p8 = scmp.ne.s32.totalorder %s1295_s26, %s1704_s11 }
 0x178   : > { %v2360_v28 = vpop.permute.xlu0 %775  ;;  %v657_v29 = vpop.permute.xlu1 %656  ;;  %v878_v44 = vadd.f32 %v876_v30, %v860_v34 }
 0x179   : > { %v658_v62 = vrot.slane %v657_v29, 2  ;;  %p1706_p11 = pnand %p1705_p8, %p2580_p3 }
 0x17a   : > { %v896_v52 = vadd.f32 %v894_v41, %v878_v44 }
 0x17b   : > { %v659_v9 = vsel %vm388_vm10, %v657_v29, %v658_v62  ;;  %p1707_p1 = pneg %p1706_p11 }
 0x17c   : > { %v675_v38 = vpop.permute.xlu0 %674  ;;  %v2364_v39 = vpop.permute.xlu1 %1010  ;;  %v661_v18 = vadd.f32 %v659_v9, %v643_v12  ;;  %v1129_v9 = vmul.f32 %v1128_v61, %v2001_v57 }
 0x17d   : > { %v676_v3 = vrot.slane %v675_v38, 2  ;;  %v1012_v62 = vrot.slane %v2364_v39, 2 }
 0x17e   : > { %v1528_v30 = vrot.slane %v1129_v9, 9  ;;  %v306_v9 = vstv %s2467_s8 }
 0x17f   : > { %v677_v14 = vsel %vm407_vm11, %v675_v38, %v676_v3 }
 0x180   : > { %v2370_v46 = vpop.permute.xlu0 %1028  ;;  %v556_v47 = vpop.permute.xlu1 %555  ;;  %v679_v29 = vadd.f32 %v677_v14, %v661_v18  ;;  %v1125_v14 = vstv %s2419_s20  ;;  %v989_v18 = vmul.f32 %v2447_v17, %v988_v2  ;;  %s1708_s20 = sshll.u32 %s1796_s16, 4  ;;  %s1709_s20 = int_to_ptr.vmem [resolvable:$false] %s1708_s20 }
 0x181   : > { %v557_v49 = vrot.slane %v556_v47, 2  ;;  %v1030_v13 = vrot.slane %v2370_v46, 2  ;;  %v1126_v41 = vmul.f32 %v2447_v17, %v1125_v14  ;;  %p1711_p13 = scmp.lt.s32.totalorder %s1295_s26, %s1709_s20 }
 0x183   : > { %v558_v54 = vsel %vm426_vm12, %v556_v47, %v557_v49  ;;  %v777_v49 = vrot.slane %v2360_v28, 2  ;;  %v1031_v34 = vsel %vm350_vm8, %v2370_v46, %v1030_v13 }
 0x184   : > { %v560_v56 = vadd.f32 %v558_v54, %v542_v51  ;;  %v2380_v58 = vpop.permute.xlu0 %793  ;;  %v910_v59 = vpop.permute.xlu1 %909  ;;  %v726_v51 = vadd.f32 %v1465_v36, %v718_v45 }
 0x185   : > { %v911_v32 = vrot.slane %v910_v59, 2  ;;  %v795_v11 = vrot.slane %v2380_v58, 2 }
 0x186   : > { %v570_v0 = vrot.slane %v560_v56, %v1963_v35  ;;  %v760_v56 = vsel %vm350_vm8, %v2356_v21, %v759_v42 }
 0x187   : > { %v912_v50 = vsel %vm369_vm9, %v910_v59, %v911_v32  ;;  %v744_v59 = vadd.f32 %v742_v48, %v726_v51  ;;  %v796_v15 = vsel %vm388_vm10, %v2380_v58, %v795_v11  ;;  %v997_v58 = vadd.f32 %v1507_v5, %v989_v18 }
 0x188   : > { %v928_v7 = vpop.permute.xlu0 %927  ;;  %v2390_v8 = vpop.permute.xlu1 %1147  ;;  %571 = vrot.lane.b32.xlu0 %v570_v0, %s1790_s28  ;;  %v914_v63 = vadd.f32 %v912_v50, %v896_v52  ;;  %v778_v0 = vsel %vm369_vm9, %v2360_v28, %v777_v49  ;;  %v1134_v48 = vadd.f32 %v1528_v30, %v1126_v41  ;;  %v309_v51 = vstv %s2441_s6 }
 0x189   : > { %v929_v10 = vrot.slane %v928_v7, 2  ;;  %v762_v6 = vadd.f32 %v760_v56, %v744_v59  ;;  %v1149_v23 = vrot.slane %v2390_v8, 2  ;;  %v310_v2 = vmul.f32 %v2447_v17, %v309_v51 }
 0x18b   : > { %v930_v60 = vsel %vm388_vm10, %v928_v7, %v929_v10  ;;  %v780_v16 = vadd.f32 %v778_v0, %v762_v6  ;;  %v1150_v10 = vsel %vm331_vm7, %v2390_v8, %v1149_v23 }
 0x18c   : > { %v2400_v19 = vpop.permute.xlu0 %1165  ;;  %v693_v22 = vpop.permute.xlu1 %692  ;;  %v932_v21 = vadd.f32 %v930_v60, %v914_v63 }
 0x18d   : > { %v694_v24 = vrot.slane %v693_v22, 2 }
 0x18f   : > { %v695_v33 = vsel %vm426_vm12, %v693_v22, %v694_v24  ;;  %v1013_v22 = vsel %vm331_vm7, %v2364_v39, %v1012_v62  ;;  %v1167_v39 = vrot.slane %v2400_v19, 2 }
 0x190   : > { %v697_v37 = vadd.f32 %v695_v33, %v679_v29  ;;  %v946_v38 = vpop.permute.xlu0 %945  ;;  %v2413_v40 = vpop.permute.xlu1 %1046  ;;  %v798_v29 = vadd.f32 %v796_v15, %v780_v16  ;;  %v1402_v15 = vrot.slane %v310_v2, 9 }
 0x191   : > { %v947_v20 = vrot.slane %v946_v38, 2  ;;  %v1048_v24 = vrot.slane %v2413_v40, 2  ;;  %v1168_v8 = vsel %vm350_vm8, %v2400_v19, %v1167_v39 }
 0x192   : > { %v707_v47 = vrot.slane %v697_v37, %v1963_v35 }
 0x193   : > { %v948_v3 = vsel %vm407_vm11, %v946_v38, %v947_v20  ;;  %v1015_v38 = vadd.f32 %v1013_v22, %v997_v58  ;;  %v1049_v44 = vsel %vm369_vm9, %v2413_v40, %v1048_v24  ;;  %v307_v22 = vmul.f32 %v2447_v17, %v306_v9 }
 0x194   : > { %v2428_v54 = vpop.permute.xlu0 %1183  ;;  %v812_v55 = vpop.permute.xlu1 %811  ;;  %708 = vrot.lane.b32.xlu1 %v707_v47, %s1791_s5  ;;  %v950_v57 = vadd.f32 %v948_v3, %v932_v21 }
 0x195   : > { %v813_v4 = vrot.slane %v812_v55, 2  ;;  %v1185_v45 = vrot.slane %v2428_v54, 2  ;;  %v1033_v47 = vadd.f32 %v1031_v34, %v1015_v38 }
 0x197   : > { %v814_v26 = vsel %vm407_vm11, %v812_v55, %v813_v4  ;;  %v1152_v55 = vadd.f32 %v1150_v10, %v1134_v48  ;;  %v1051_v56 = vadd.f32 %v1049_v44, %v1033_v47  ;;  %v1186_v60 = vsel %vm369_vm9, %v2428_v54, %v1185_v45 }
 0x198   : > { %v964_v12 = vpop.permute.xlu0 %963  ;;  %v1065_v7 = vpop.permute.xlu1 %1064  ;;  %v816_v42 = vadd.f32 %v814_v26, %v798_v29  ;;  %v315_v26 = vadd.f32 %v1402_v15, %v307_v22  ;;  %v1264_v22 = vsub.s32 0, %v1960_v25 }
 0x199   : > { %v965_v28 = vrot.slane %v964_v12, 2  ;;  %v1066_v36 = vrot.slane %v1065_v7, 2  ;;  %v1170_v62 = vadd.f32 %v1168_v8, %v1152_v55 }
 0x19b   : > { %v966_v27 = vsel %vm426_vm12, %v964_v12, %v965_v28  ;;  %v1067_v52 = vsel %vm388_vm10, %v1065_v7, %v1066_v36  ;;  %v1188_v6 = vadd.f32 %v1186_v60, %v1170_v62 }
 0x19c   : > { %v968_v31 = vadd.f32 %v966_v27, %v950_v57  ;;  %v1202_v32 = vpop.permute.xlu0 %1201  ;;  %v830_v33 = vpop.permute.xlu1 %829  ;;  %v1069_v63 = vadd.f32 %v1067_v52, %v1051_v56 }
 0x19d   : > { %v831_v37 = vrot.slane %v830_v33, 2  ;;  %v1203_v40 = vrot.slane %v1202_v32, 2 }
 0x19e   : > { %v978_v43 = vrot.slane %v968_v31, %v1963_v35 }
 0x19f   : > { %v832_v46 = vsel %vm426_vm12, %v830_v33, %v831_v37  ;;  %v1204_v3 = vsel %vm388_vm10, %v1202_v32, %v1203_v40 }
 0x1a0   : > { %v834_v49 = vadd.f32 %v832_v46, %v816_v42  ;;  %v1220_v50 = vpop.permute.xlu0 %1219  ;;  %v1083_v20 = vpop.permute.xlu1 %1082  ;;  %979 = vrot.lane.b32.xlu1 %v978_v43, %s1792_s4  ;;  %v1206_v7 = vadd.f32 %v1204_v3, %v1188_v6 }
 0x1a1   : > { %v1084_v53 = vrot.slane %v1083_v20, 2  ;;  %v1221_v61 = vrot.slane %v1220_v50, 2 }
 0x1a2   : > { %v842_v11 = vrot.slane %v834_v49, %v1963_v35 }
 0x1a3   : > { %v1085_v59 = vsel %vm407_vm11, %v1083_v20, %v1084_v53  ;;  %v1222_v21 = vsel %vm407_vm11, %v1220_v50, %v1221_v61  ;;  %v304_v50 = vld [vmem:[#allocation7] sm:$0x3] }
 0x1a4   : > { %v1101_v0 = vpop.permute.xlu1 %1100  ;;  %843 = vrot.lane.b32.xlu0 %v842_v11, %s1793_s23  ;;  %v329_v19 = vpop.permute.xlu0 %328  ;;  %v1087_v5 = vadd.f32 %v1085_v59, %v1069_v63  ;;  %v1224_v18 = vadd.f32 %v1222_v21, %v1206_v7  ;;  %v561_v51 = vadd.s32 4294967294, %v304_v50  ;;  %v430_v52 = vadd.s32 4294967293, %v304_v50 }
 0x1a5   : > { %v1102_v4 = vrot.slane %v1101_v0, 2  ;;  %v330_v12 = vrot.slane %v329_v19, 2  ;;  %v698_v40 = vadd.s32 4294967295, %v304_v50  ;;  %v1106_v2 = vadd.s32 2, %v304_v50 }
 0x1a6   : > { %vm562_vm15 = vcmp.ge.s32.totalorder %v561_v51, 0  ;;  %vm431_vm0 = vcmp.ge.s32.totalorder %v430_v52, 0 }
 0x1a7   : > { %v1103_v54 = vsel %vm426_vm12, %v1101_v0, %v1102_v4  ;;  %v332_v23 = vsel %vm331_vm7, %v329_v19, %v330_v12  ;;  %vm699_vm1 = vcmp.ge.s32.totalorder %v698_v40, 0  ;;  %v969_v19 = vadd.s32 1, %v304_v50 }
 0x1a8   : > { %v1105_v13 = vadd.f32 %v1103_v54, %v1087_v5  ;;  %v1238_v14 = vpop.permute.xlu1 %1237  ;;  %v367_v28 = vpop.permute.xlu0 %366  ;;  %v334_v31 = vadd.f32 %v332_v23, %v315_v26  ;;  %vm1107_vm5 = vcmp.lt.s32.totalorder %v1106_v2, 16  ;;  %v1243_v12 = vadd.s32 3, %v304_v50 }
 0x1a9   : > { %v1239_v16 = vrot.slane %v1238_v14, 2  ;;  %v368_v29 = vrot.slane %v367_v28, 2  ;;  %vm970_vm4 = vcmp.lt.s32.totalorder %v969_v19, 16  ;;  %vm1256_vm7 = vcmask 998400  }
 0x1aa   : > { %v1115_v57 = vrot.slane %v1105_v13, %v1963_v35 }
 0x1ab   : > { %v1240_v24 = vsel %vm426_vm12, %v1238_v14, %v1239_v16  ;;  %v370_v36 = vsel %vm369_vm9, %v367_v28, %v368_v29  ;;  %v1638_v29 = vld [vmem:[%s1949_s22] sm:$0xff]  ;;  %s1710_s22 = scalar_lea.vmem %s1709_s20, 256 }
 0x1ac   : > { %v1242_v27 = vadd.f32 %v1240_v24, %v1224_v18  ;;  %v348_v58 = vpop.permute.xlu1 %347  ;;  %1116 = vrot.lane.b32.xlu0 %v1115_v57, %s1794_s0  ;;  %v405_v32 = vpop.permute.xlu0 %404  ;;  %v1268_v57 = vsub.s32 1, %v1960_v25  ;;  %p1712_p0 = scmp.lt.s32.totalorder %s1710_s22, %s1704_s11 }
 0x1ad   : > { %v349_v30 = vrot.slane %v348_v58, 2  ;;  %v406_v37 = vrot.slane %v405_v32, 2 }
 0x1ae   : > { %v1252_v33 = vrot.slane %v1242_v27, %v1963_v35  ;;  %p1713_p2 = por %p1712_p0, %p1711_p13 }
 0x1af   : > { %v351_v34 = vsel %vm350_vm8, %v348_v58, %v349_v30  ;;  %v408_v44 = vsel %vm407_vm11, %v405_v32, %v406_v37  ;;  %vm1244_vm8 = vcmp.lt.s32.totalorder %v1243_v12, 16 }
 0x1b0   : > { %v353_v17 = vadd.f32 %v351_v34, %v334_v31  ;;  %1253 = vrot.lane.b32.xlu1 %v1252_v33, %s1795_s17  ;;  %v386_v39 = vpop.permute.xlu1 %385  ;;  %p1714_p5 = pnand %p1713_p2, %p1707_p1 }
 0x1b1   : > { %v387_v38 = vrot.slane %v386_v39, 2 }
 0x1b2   : > { %v372_v41 = vadd.f32 %v370_v36, %v353_v17 }
 0x1b3   : > { %v389_v42 = vsel %vm388_vm10, %v386_v39, %v387_v38 }
 0x1b4   : > { %v391_v43 = vadd.f32 %v389_v42, %v372_v41  ;;  %v424_v10 = vpop.permute.xlu1 %423 }
 0x1b5   : > { %v425_v45 = vrot.slane %v424_v10, 2 }
 0x1b6   : > { %v410_v46 = vadd.f32 %v408_v44, %v391_v43 }
 0x1b7   : > { %v427_v47 = vsel %vm426_vm12, %v424_v10, %v425_v45 }
 0x1b8   : > { %v429_v48 = vadd.f32 %v427_v47, %v410_v46 }
 0x1ba   : > { %v439_v56 = vrot.slane %v429_v48, %v1963_v35 }
 0x1bc   : > { %v441_v63 = vsel %vm431_vm0, %v439_v56, 0.0 }
 0x1fa   : > { %v572_v49 = vpop.permute.xlu0 %571 }
 0x1fb   : > { %v573_v8 = vrot.slane %v572_v49, 1 }
 0x1fd   : > { %v575_v55 = vsel %vm574_vm13, %v572_v49, %v573_v8 }
 0x1fe   : > { %v577_v61 = vsel %vm562_vm15, %v575_v55, 0.0 }
 0x1ff   : > { %v578_v3 = vadd.f32 %v577_v61, %v441_v63 }
 0x206   : > { %v709_v20 = vpop.permute.xlu1 %708 }
 0x207   : > { %v710_v53 = vrot.slane %v709_v20, 1 }
 0x209   : > { %v712_v60 = vsel %vm711_vm14, %v709_v20, %v710_v53 }
 0x20a   : > { %v714_v0 = vsel %vm699_vm1, %v712_v60, 0.0 }
 0x20b   : > { %v715_v5 = vadd.f32 %v714_v0, %v578_v3 }
 0x212   : > { %v980_v59 = vpop.permute.xlu1 %979 }
 0x213   : > { %v981_v4 = vrot.slane %v980_v59, 1 }
 0x215   : > { %v983_v21 = vsel %vm982_vm3, %v980_v59, %v981_v4 }
 0x216   : > { %v844_v11 = vpop.permute.xlu0 %843  ;;  %v985_v13 = vsel %vm970_vm4, %v983_v21, 0.0 }
 0x217   : > { %v845_v62 = vrot.slane %v844_v11, 1 }
 0x219   : > { %v847_v6 = vsel %vm846_vm2, %v844_v11, %v845_v62 }
 0x21a   : > { %v849_v54 = vadd.f32 %v847_v6, %v715_v5 }
 0x21c   : > { %v986_v28 = vadd.f32 %v985_v13, %v849_v54 }
 0x21e   : > { %v1117_v35 = vpop.permute.xlu0 %1116 }
 0x21f   : > { %v1118_v9 = vrot.slane %v1117_v35, 1 }
 0x221   : > { %v1120_v7 = vsel %vm1119_vm6, %v1117_v35, %v1118_v9 }
 0x222   : > { %v1122_v15 = vsel %vm1107_vm5, %v1120_v7, 0.0  ;;  %v1254_v14 = vpop.permute.xlu1 %1253 }
 0x223   : > { %v1255_v16 = vrot.slane %v1254_v14, 1  ;;  %v1123_v18 = vadd.f32 %v1122_v15, %v986_v28 }
 0x225   : > { %v1257_v23 = vsel %vm1256_vm7, %v1254_v14, %v1255_v16 }
 0x226   : > { %v1259_v24 = vsel %vm1244_vm8, %v1257_v23, 0.0 }
 0x227   : > { %v1260_v26 = vadd.f32 %v1259_v24, %v1123_v18 }
 0x229   : > { %v1265_v27 = vrot.slane %v1260_v26, %v1264_v22  ;;  %v1269_v58 = vrot.slane %v1260_v26, %v1268_v57 }
 0x22b   : > { %v1272_v30 = vmul.f32 %v1638_v29, %v1265_v27  ;;  %v1273_v31 = vmul.f32 %v1269_v58, %v1956_v1 }
 0x22d   : > { %v1276_v32 = vcombine.low %v1272_v30, %v1273_v31 }
 0x22f   : > { %1278 = vst [vmem:[%s211_s25] sm:$0xff] %v1276_v32 }
 0x230   : > { %1717 = shalt.err (!%p1714_p5)
}
 0x231   : > { %s1718_s5 = scalar_lea.hbm %s1292_s30, 128  ;;  %s1722_s8 = scalar_lea.hbm %s2537_s3, 256 }
 0x232   : > { %p1719_p7 = scmp.ne.s32.totalorder %s1292_s30, %s1718_s5  ;;  %p1723_p12 = scmp.lt.s32.totalorder %s1292_s30, %s2537_s3 }
 0x233   : > { %p1724_p9 = scmp.lt.s32.totalorder %s1722_s8, %s1718_s5 }
 0x234   : > { %p1720_p10 = pnand %p1719_p7, %p2580_p3 }
 0x235   : > { %p1725_p4 = por %p1724_p9, %p1723_p12 }
 0x236   : > { %p1721_p6 = pneg %p1720_p10 }
 0x238   : > { %p1726_p8 = pnand %p1725_p4, %p1721_p6 }
 0x23a   : > { %1729 = shalt.err (!%p1726_p8)
}
 0x23b   : > { %1564 = dma.vmem_to_hbm [thread:$0]  (%p2580_p3), %s1295_s26, 128, %s1292_s30, %s1280_s29  }
 0x23c PF: > { %s1306_s0 = sand.u32 1, %s1764_s12   ;;  %p2581_p11 = scmp.ne.s32.totalorder %s2556_s19, 0 }
 0x23d   : > { %p2582_p1 = scmp.ge.s32.totalorder %s1776_s15, 2  ;;  %s1307_s17 = scalar_lea.sflag [#allocation5], %s1306_s0 }
 0x23f   : > { %p1578_p13 = pnand %p2582_p1, %p2581_p11 }
 0x241   : > { %p1579_p0 = pneg %p1578_p13 }
 0x243   : > { %1759 = dma.done.wait (%p1579_p0), %s1307_s17, 128  }
 0x244   : > { %1761 = vsyncadd (%p1579_p0), %s1307_s17, 4294967168  ;;  %p18_p2 = scmp.ge.s32.totalorder %s1871_s24, 4   ;;  %s2583_s12 = smov %s1768_s13 }
 0x245   : > { %s2584_s13 = smov %s1772_s14  ;;  %s2585_s14 = smov %s1895_s7 }
 0x246   : > { %s2586_s15 = smov %s1871_s24  ;;  %20 = sbr.rel (!%p18_p2) target bundleno = 9 (0x9), region = 88 }
 0x24b   :  { %1312 = vsyncpa [#allocation4], 1 }
 0x24c   :  { %1314 = vsyncpa [#allocation4 + $0x1], 1 }
 0x24d   :  { %1315 = vsyncpa [#allocation9], 1 }
 0x24e   :  { %1317 = vsyncpa [#allocation9 + $0x1], 1 }
 0x24f   :  { %1318 = vsyncpa [#allocation5], 1 }
 0x250   :  { %1320 = vsyncpa [#allocation5 + $0x1], 1 }
 0x251   :  { %1321 = vsyncpa [#allocation6], 1 }
 0x252   :  { %1323 = vsyncpa [#allocation6 + $0x1], 1 }

</bundles_post_ra>
